<compile_context>
chip_gen: v6e
topology: v6e:2x2x1
jax: 0.10.0
libtpu: 0.0.40
codegen_flags: <defaults>
</compile_context>

<pallas_src>
import math

import jax
import jax.numpy as jnp
from jax.experimental import pallas as pl
from jax.experimental.pallas import tpu as pltpu

_BN_EPS = 1e-5   # nn.BatchNorm1d default eps
_L2_EPS = 1e-12  # F.normalize default eps


def _netvlad_kernel(x_ref, wc_ref, g1_ref, b1_ref, wh_ref, g2_ref, b2_ref,
                    wg_ref, gg_ref, bg_ref, out_ref, vlad_scr, hid_acc):
    c = pl.program_id(0)
    n_chunks = pl.num_programs(0)
    B, N, D = x_ref.shape
    K = vlad_scr.shape[0]
    k_chunk = wh_ref.shape[0]

    # ----- stage 1 (first grid step only): assignment, BN1, softmax, VLAD, norms -----
    @pl.when(c == 0)
    def _stage1():
        x = x_ref[...]                                   # (B, N, D), compute dtype
        xf = x.reshape(B * N, D)                         # free leading-dim merge

        # soft cluster assignment: one (B*N, D) @ (D, K) MXU matmul
        act = jnp.dot(xf, wc_ref[...], preferred_element_type=jnp.float32)

        # BatchNorm1d(cluster_size): train-mode batch stats (one-pass, clamped)
        inv_bn = 1.0 / (B * N)
        m1 = jnp.sum(act, axis=0, keepdims=True) * inv_bn
        m2 = jnp.sum(act * act, axis=0, keepdims=True) * inv_bn
        var1 = jnp.maximum(m2 - m1 * m1, 0.0)
        act = (act - m1) * (jax.lax.rsqrt(var1 + _BN_EPS) * g1_ref[...]) + b1_ref[...]

        # softmax over clusters (EUP exp + approximate reciprocal)
        act = jnp.exp(act - jnp.max(act, axis=-1, keepdims=True))
        act = act * pl.reciprocal(jnp.sum(act, axis=-1, keepdims=True), approx=True)

        # VLAD: transpose act (the SMALL operand, never x) so the batched
        # contraction is MXU-natural: (B,K,N) @ (B,N,D) -> (B,K,D).
        actT = jnp.swapaxes(act.reshape(B, N, K), 1, 2).astype(x.dtype)
        vlad = jnp.einsum("bkn,bnd->bkd", actT, x,
                          preferred_element_type=jnp.float32)           # f32

        # intra-norm (over D per cluster) + global L2 norm folded into ONE scale
        ssq = jnp.sum(vlad * vlad, axis=-1, keepdims=True)              # (B, K, 1)
        intra = jax.lax.rsqrt(jnp.maximum(ssq, _L2_EPS * _L2_EPS))
        gsq = jnp.sum(ssq * (intra * intra), axis=1, keepdims=True)     # (B, 1, 1)
        gscale = jax.lax.rsqrt(jnp.maximum(gsq, _L2_EPS * _L2_EPS))
        vlad = vlad * (intra * gscale)

        # cluster-major scratch: per-chunk reads become leading-dim dynamic slices
        vlad_scr[...] = jnp.transpose(vlad, (1, 0, 2)).astype(vlad_scr.dtype)
        hid_acc[...] = jnp.zeros_like(hid_acc)

    # ----- streamed hidden projection: accumulate this chunk's clusters -----
    k0 = pl.multiple_of(c * k_chunk, k_chunk)
    vchunk = vlad_scr[pl.ds(k0, k_chunk)]                # (k_chunk, B, D)
    wchunk = wh_ref[...]                                 # (k_chunk, D, O)
    acc = hid_acc[...]
    for j in range(k_chunk):                             # static unroll, small
        acc = acc + jnp.dot(vchunk[j], wchunk[j],
                            preferred_element_type=jnp.float32)
    hid_acc[...] = acc

    # ----- finalize (last grid step only): BN2 + context gating -----
    @pl.when(c == n_chunks - 1)
    def _finalize():
        hid = hid_acc[...]                               # (B, O), f32
        inv_b = 1.0 / B
        h1 = jnp.sum(hid, axis=0, keepdims=True) * inv_b
        h2 = jnp.sum(hid * hid, axis=0, keepdims=True) * inv_b
        var2 = jnp.maximum(h2 - h1 * h1, 0.0)
        hid = (hid - h1) * (jax.lax.rsqrt(var2 + _BN_EPS) * g2_ref[...]) + b2_ref[...]

        gates = jnp.dot(hid.astype(wg_ref.dtype), wg_ref[...],
                        preferred_element_type=jnp.float32)
        n1 = jnp.sum(gates, axis=0, keepdims=True) * inv_b
        n2 = jnp.sum(gates * gates, axis=0, keepdims=True) * inv_b
        varg = jnp.maximum(n2 - n1 * n1, 0.0)
        gates = (gates - n1) * (jax.lax.rsqrt(varg + _BN_EPS) * gg_ref[...]) + bg_ref[...]
        gates = jax.nn.sigmoid(gates)

        out_ref[...] = (hid * gates).astype(out_ref.dtype)


def prepare_params(params, compute_dtype=jnp.float32):
    """One-time (per checkpoint) weight relayout / cast, hoisted out of the per-call
    path: the hidden1_weights relayout reads+writes the largest parameter tensor in
    HBM, so doing it every forward would roughly double the kernel's HBM traffic."""
    D, K = params["cluster_weights"].shape
    O = params["hidden1_weights"].shape[1]
    # hidden1_weights rows are (d-major, k-minor); regroup cluster-major so
    # wh[k, d, :] == hidden1_weights[d * K + k, :].
    wh = jnp.transpose(params["hidden1_weights"].reshape(D, K, O), (1, 0, 2))
    return {
        "wc": params["cluster_weights"].astype(compute_dtype),
        "wh": wh.astype(compute_dtype),
        "wg": params["gating_weights"].astype(compute_dtype),
        "g1": params["bn1_gamma"].reshape(1, K).astype(jnp.float32),
        "b1": params["bn1_beta"].reshape(1, K).astype(jnp.float32),
        "g2": params["bn2_gamma"].reshape(1, O).astype(jnp.float32),
        "b2": params["bn2_beta"].reshape(1, O).astype(jnp.float32),
        "gg": params["gate_bn_gamma"].reshape(1, O).astype(jnp.float32),
        "bg": params["gate_bn_beta"].reshape(1, O).astype(jnp.float32),
    }


def _pick_k_chunk(K, k_chunk):
    if k_chunk is None:
        k_chunk = min(K, 8)
    k_chunk = max(1, min(int(k_chunk), K))
    while K % k_chunk:
        k_chunk -= 1
    return k_chunk


def _estimate_vmem_bytes(B, N, D, K, O, k_chunk, cs):
    """Generous resident-set estimate (double-buffered operands + scratch + temps)."""
    f32 = 4
    db = 2
    inputs = db * (B * N * D * cs + D * K * cs + k_chunk * D * O * cs
                   + O * O * cs + 2 * K * f32 + 6 * O * f32)
    outputs = db * (B * O * f32)
    scratch = K * B * D * cs + B * O * f32
    interm = (3 * B * N * K * f32        # act / exp / probs
              + 3 * B * K * D * f32      # vlad + scaled + transposed copy
              + 4 * B * O * f32)         # hid / gates temporaries
    return inputs + outputs + scratch + interm + (2 << 20)


def netvlad_loupe_forward(x_nchw, prepared, *, k_chunk=None, vmem_limit_bytes=None):
    """x_nchw: (B, feature_size, max_samples, 1) — the PyTorch module's NCHW input."""
    compute_dtype = prepared["wc"].dtype
    _, D, N, _ = x_nchw.shape
    K, _, O = prepared["wh"].shape

    # torch: x.transpose(1, 3).contiguous().view(-1, max_samples, feature_size)
    # TODO(synk): consuming x in native (B, D, N) layout would drop this extra HBM
    # round-trip of x at the cost of an in-kernel XLU transpose of the large operand.
    x = jnp.transpose(x_nchw, (0, 3, 2, 1)).reshape(-1, N, D).astype(compute_dtype)
    B = x.shape[0]

    k_chunk = _pick_k_chunk(K, k_chunk)
    n_chunks = K // k_chunk
    cs = jnp.dtype(compute_dtype).itemsize
    if vmem_limit_bytes is None:
        est = _estimate_vmem_bytes(B, N, D, K, O, k_chunk, cs)
        vmem_limit_bytes = int(min(max(est, 32 * 1024 * 1024), 120 * 1024 * 1024))

    in_specs = [
        pl.BlockSpec((B, N, D), lambda c: (0, 0, 0)),        # x (resident, DMA'd once)
        pl.BlockSpec((D, K), lambda c: (0, 0)),               # cluster weights
        pl.BlockSpec((1, K), lambda c: (0, 0)),                # bn1 gamma
        pl.BlockSpec((1, K), lambda c: (0, 0)),                # bn1 beta
        pl.BlockSpec((k_chunk, D, O), lambda c: (c, 0, 0)),    # hidden weights (streamed)
        pl.BlockSpec((1, O), lambda c: (0, 0)),                # bn2 gamma
        pl.BlockSpec((1, O), lambda c: (0, 0)),                # bn2 beta
        pl.BlockSpec((O, O), lambda c: (0, 0)),                # gating weights
        pl.BlockSpec((1, O), lambda c: (0, 0)),                # gate bn gamma
        pl.BlockSpec((1, O), lambda c: (0, 0)),                # gate bn beta
    ]
    out_spec = pl.BlockSpec((B, O), lambda c: (0, 0))

    return pl.pallas_call(
        _netvlad_kernel,
        out_shape=jax.ShapeDtypeStruct((B, O), jnp.float32),
        grid=(n_chunks,),
        in_specs=in_specs,
        out_specs=out_spec,
        scratch_shapes=[pltpu.VMEM((K, B, D), compute_dtype),   # normalized VLAD
                        pltpu.VMEM((B, O), jnp.float32)],       # hidden accumulator
        compiler_params=pltpu.CompilerParams(
            dimension_semantics=("arbitrary",),                 # sequential accumulator axis
            vmem_limit_bytes=int(vmem_limit_bytes)),
    )(x, prepared["wc"], prepared["g1"], prepared["b1"], prepared["wh"],
      prepared["g2"], prepared["b2"], prepared["wg"], prepared["gg"], prepared["bg"])


def init_params(key, feature_size, cluster_size, output_dim):
    ks = jax.random.split(key, 8)
    p = {}
    p["cluster_weights"] = (
        jax.random.normal(ks[0], (feature_size, cluster_size), jnp.float32)
        / math.sqrt(feature_size))
    p["hidden1_weights"] = (
        jax.random.normal(ks[1], (cluster_size * feature_size, output_dim),
                          jnp.float32) / math.sqrt(feature_size))
    p["gating_weights"] = (
        jax.random.normal(ks[2], (output_dim, output_dim), jnp.float32)
        / math.sqrt(output_dim))
    p["bn1_gamma"] = 1.0 + 0.1 * jax.random.normal(ks[3], (cluster_size,), jnp.float32)
    p["bn1_beta"] = 0.1 * jax.random.normal(ks[4], (cluster_size,), jnp.float32)
    p["bn2_gamma"] = 1.0 + 0.1 * jax.random.normal(ks[5], (output_dim,), jnp.float32)
    p["bn2_beta"] = 0.1 * jax.random.normal(ks[6], (output_dim,), jnp.float32)
    p["gate_bn_gamma"] = 1.0 + 0.1 * jax.random.normal(ks[7], (output_dim,), jnp.float32)
    p["gate_bn_beta"] = jnp.zeros((output_dim,), jnp.float32)
    return p


def reference_forward(x_nchw, params):
    """Pure-JAX mirror of the PyTorch forward (train-mode BN), for verification."""
    _, D, N, _ = x_nchw.shape
    x = jnp.transpose(x_nchw, (0, 3, 2, 1)).reshape(-1, N, D).astype(jnp.float32)
    B = x.shape[0]
    K = params["cluster_weights"].shape[1]

    act = jnp.einsum("bnd,dk->bnk", x, params["cluster_weights"]).reshape(-1, K)
    mu = act.mean(0)
    var = ((act - mu) ** 2).mean(0)
    act = (act - mu) / jnp.sqrt(var + _BN_EPS) * params["bn1_gamma"] + params["bn1_beta"]
    act = jax.nn.softmax(act.reshape(B, N, K), axis=-1)

    vlad = jnp.einsum("bkn,bnd->bkd", jnp.swapaxes(act, 1, 2), x)
    vlad = jnp.swapaxes(vlad, 1, 2)                                   # (B, D, K)
    vlad = vlad / jnp.maximum(jnp.linalg.norm(vlad, axis=1, keepdims=True), _L2_EPS)
    vlad = vlad.reshape(B, D * K)
    vlad = vlad / jnp.maximum(jnp.linalg.norm(vlad, axis=1, keepdims=True), _L2_EPS)

    hid = vlad @ params["hidden1_weights"]
    mu = hid.mean(0)
    var = ((hid - mu) ** 2).mean(0)
    hid = (hid - mu) / jnp.sqrt(var + _BN_EPS) * params["bn2_gamma"] + params["bn2_beta"]

    gates = hid @ params["gating_weights"]
    mu = gates.mean(0)
    var = ((gates - mu) ** 2).mean(0)
    gates = (gates - mu) / jnp.sqrt(var + _BN_EPS) * params["gate_bn_gamma"] + params["gate_bn_beta"]
    return hid * jax.nn.sigmoid(gates)


if __name__ == "__main__":
    batch = 4
    feature_size = 128      # lane-aligned feature dim
    max_samples = 64
    cluster_size = 8
    output_dim = 128        # lane-aligned output dim

    key = jax.random.PRNGKey(0)
    kx, kp = jax.random.split(key)
    # PyTorch-style NCHW input: (B, feature_size, max_samples, 1)
    x = jax.random.normal(kx, (batch, feature_size, max_samples, 1), jnp.float32)
    params = init_params(kp, feature_size, cluster_size, output_dim)

    # One-time weight relayout / cast, hoisted out of the per-call path.
    prepared_f32 = prepare_params(params, compute_dtype=jnp.float32)

    # k_chunk=2 -> 4 grid steps: exercises the streamed hidden-projection pipeline.
    out = jax.block_until_ready(netvlad_loupe_forward(x, prepared_f32, k_chunk=2))
    ref = jax.block_until_ready(reference_forward(x, params))
    assert out.shape == (batch, output_dim)
    max_err = float(jnp.max(jnp.abs(out - ref)))
    assert max_err < 5e-2, f"f32 max abs err {max_err}"

    # bf16 MXU-operand variant (recommended on HBM-bound generations / v7x VMEM):
    # run + finiteness sanity check only (train-mode BN over a tiny batch is too
    # batch-composition-sensitive for a tight bf16-vs-f32 comparison).
    prepared_bf16 = prepare_params(params, compute_dtype=jnp.bfloat16)
    out_bf16 = jax.block_until_ready(netvlad_loupe_forward(x, prepared_bf16, k_chunk=4))
    assert out_bf16.shape == (batch, output_dim)
    assert bool(jnp.all(jnp.isfinite(out_bf16)))

    print("KERNEL_OK")
</pallas_src>

<mosaic_0001>
module attributes {stable_mosaic.version = 11 : i64} {
  func.func @_netvlad_kernel(%arg0: i32, %arg1: memref<4x64x128xf32, #tpu.memory_space<vmem>>, %arg2: memref<128x8xf32, #tpu.memory_space<vmem>>, %arg3: memref<1x8xf32, #tpu.memory_space<vmem>>, %arg4: memref<1x8xf32, #tpu.memory_space<vmem>>, %arg5: memref<2x128x128xf32, #tpu.memory_space<vmem>>, %arg6: memref<1x128xf32, #tpu.memory_space<vmem>>, %arg7: memref<1x128xf32, #tpu.memory_space<vmem>>, %arg8: memref<128x128xf32, #tpu.memory_space<vmem>>, %arg9: memref<1x128xf32, #tpu.memory_space<vmem>>, %arg10: memref<1x128xf32, #tpu.memory_space<vmem>>, %arg11: memref<4x128xf32, #tpu.memory_space<vmem>>, %arg12: memref<8x4x128xf32, #tpu.memory_space<vmem>>, %arg13: memref<4x128xf32, #tpu.memory_space<vmem>>) attributes {dimension_semantics = [#tpu.dimension_semantics<arbitrary>], iteration_bounds = array<i64: 4>, scalar_prefetch = 0 : i64, scratch_operands = 2 : i64, tpu.core_type = #tpu.core_type<tc>, window_params = [{pipeline_mode = #tpu.pipeline_mode<synchronous>, transform_indices = @transform_0, window_bounds = array<i64: 4, 64, 128>}, {pipeline_mode = #tpu.pipeline_mode<synchronous>, transform_indices = @transform_1, window_bounds = array<i64: 128, 8>}, {pipeline_mode = #tpu.pipeline_mode<synchronous>, transform_indices = @transform_2, window_bounds = array<i64: 1, 8>}, {pipeline_mode = #tpu.pipeline_mode<synchronous>, transform_indices = @transform_3, window_bounds = array<i64: 1, 8>}, {transform_indices = @transform_4, window_bounds = array<i64: 2, 128, 128>}, {pipeline_mode = #tpu.pipeline_mode<synchronous>, transform_indices = @transform_5, window_bounds = array<i64: 1, 128>}, {pipeline_mode = #tpu.pipeline_mode<synchronous>, transform_indices = @transform_6, window_bounds = array<i64: 1, 128>}, {pipeline_mode = #tpu.pipeline_mode<synchronous>, transform_indices = @transform_7, window_bounds = array<i64: 128, 128>}, {pipeline_mode = #tpu.pipeline_mode<synchronous>, transform_indices = @transform_8, window_bounds = array<i64: 1, 128>}, {pipeline_mode = #tpu.pipeline_mode<synchronous>, transform_indices = @transform_9, window_bounds = array<i64: 1, 128>}, {pipeline_mode = #tpu.pipeline_mode<synchronous>, transform_indices = @transform_10, window_bounds = array<i64: 4, 128>}]} {
    %c0_i32 = arith.constant 0 : i32
    %0 = arith.cmpi eq, %arg0, %c0_i32 : i32
    %1 = arith.extui %0 : i1 to i32
    %c0_i32_0 = arith.constant 0 : i32
    %2 = arith.cmpi ne, %1, %c0_i32_0 : i32
    scf.if %2 {
      %c0_11 = arith.constant 0 : index
      %c0_12 = arith.constant 0 : index
      %c0_13 = arith.constant 0 : index
      %25 = vector.load %arg1[%c0_11, %c0_12, %c0_13] : memref<4x64x128xf32, #tpu.memory_space<vmem>>, vector<4x64x128xf32>
      %26 = vector.shape_cast %25 : vector<4x64x128xf32> to vector<256x128xf32>
      %c0_14 = arith.constant 0 : index
      %c0_15 = arith.constant 0 : index
      %27 = vector.load %arg2[%c0_14, %c0_15] : memref<128x8xf32, #tpu.memory_space<vmem>>, vector<128x8xf32>
      %cst_16 = arith.constant dense<0.000000e+00> : vector<256x8xf32>
      %28 = tpu.matmul %26, %27, %cst_16 {dimension_numbers = #tpu.dot_dimension_numbers<[1], [0], [0], [1], [0, 0, 1, 1], [], []>} : vector<256x128xf32>, vector<128x8xf32>, vector<256x8xf32> -> vector<256x8xf32>
      %cst_17 = arith.constant dense<0.000000e+00> : vector<8xf32>
      %29 = vector.multi_reduction <add>, %28, %cst_17 [0] : vector<256x8xf32> to vector<8xf32>
      %30 = vector.shape_cast %29 : vector<8xf32> to vector<1x8xf32>
      %cst_18 = arith.constant 3.906250e-03 : f32
      %31 = vector.broadcast %cst_18 : f32 to vector<1x8xf32>
      %32 = arith.mulf %30, %31 : vector<1x8xf32>
      %33 = arith.mulf %28, %28 : vector<256x8xf32>
      %cst_19 = arith.constant dense<0.000000e+00> : vector<8xf32>
      %34 = vector.multi_reduction <add>, %33, %cst_19 [0] : vector<256x8xf32> to vector<8xf32>
      %35 = vector.shape_cast %34 : vector<8xf32> to vector<1x8xf32>
      %cst_20 = arith.constant 3.906250e-03 : f32
      %36 = vector.broadcast %cst_20 : f32 to vector<1x8xf32>
      %37 = arith.mulf %35, %36 : vector<1x8xf32>
      %38 = arith.mulf %32, %32 : vector<1x8xf32>
      %39 = arith.subf %37, %38 : vector<1x8xf32>
      %cst_21 = arith.constant 0.000000e+00 : f32
      %40 = vector.broadcast %cst_21 : f32 to vector<1x8xf32>
      %41 = arith.maximumf %39, %40 : vector<1x8xf32>
      %42 = vector.broadcast %32 : vector<1x8xf32> to vector<256x8xf32>
      %43 = arith.subf %28, %42 : vector<256x8xf32>
      %cst_22 = arith.constant 9.99999974E-6 : f32
      %44 = vector.broadcast %cst_22 : f32 to vector<1x8xf32>
      %45 = arith.addf %41, %44 : vector<1x8xf32>
      %46 = math.rsqrt %45 : vector<1x8xf32>
      %c0_23 = arith.constant 0 : index
      %c0_24 = arith.constant 0 : index
      %47 = vector.load %arg3[%c0_23, %c0_24] : memref<1x8xf32, #tpu.memory_space<vmem>>, vector<1x8xf32>
      %48 = arith.mulf %46, %47 : vector<1x8xf32>
      %49 = vector.broadcast %48 : vector<1x8xf32> to vector<256x8xf32>
      %50 = arith.mulf %43, %49 : vector<256x8xf32>
      %c0_25 = arith.constant 0 : index
      %c0_26 = arith.constant 0 : index
      %51 = vector.load %arg4[%c0_25, %c0_26] : memref<1x8xf32, #tpu.memory_space<vmem>>, vector<1x8xf32>
      %52 = vector.broadcast %51 : vector<1x8xf32> to vector<256x8xf32>
      %53 = arith.addf %50, %52 : vector<256x8xf32>
      %cst_27 = arith.constant dense<0xFF800000> : vector<256xf32>
      %54 = vector.multi_reduction <maximumf>, %53, %cst_27 [1] : vector<256x8xf32> to vector<256xf32>
      %55 = vector.shape_cast %54 : vector<256xf32> to vector<256x1xf32>
      %56 = vector.broadcast %55 : vector<256x1xf32> to vector<256x8xf32>
      %57 = arith.subf %53, %56 : vector<256x8xf32>
      %58 = math.exp %57 : vector<256x8xf32>
      %cst_28 = arith.constant dense<0.000000e+00> : vector<256xf32>
      %59 = vector.multi_reduction <add>, %58, %cst_28 [1] : vector<256x8xf32> to vector<256xf32>
      %60 = vector.shape_cast %59 : vector<256xf32> to vector<256x1xf32>
      %61 = tpu.reciprocal %60 {approx = true} : vector<256x1xf32> -> vector<256x1xf32>
      %62 = vector.broadcast %61 : vector<256x1xf32> to vector<256x8xf32>
      %63 = arith.mulf %58, %62 : vector<256x8xf32>
      %64 = vector.shape_cast %63 : vector<256x8xf32> to vector<4x64x8xf32>
      %65 = tpu.transpose %64, [0, 2, 1] : vector<4x64x8xf32> -> vector<4x8x64xf32>
      "tpu.trace_start"() <{level = 10 : i32, message = "bkn,bnd->bkd"}> : () -> ()
      %cst_29 = arith.constant dense<0.000000e+00> : vector<4x8x128xf32>
      %66 = tpu.matmul %65, %25, %cst_29 {dimension_numbers = #tpu.dot_dimension_numbers<[2], [1], [1], [2], [0, 0, 0, 1, 1, 2], [0], [0]>} : vector<4x8x64xf32>, vector<4x64x128xf32>, vector<4x8x128xf32> -> vector<4x8x128xf32>
      "tpu.trace_stop"() : () -> ()
      %67 = arith.mulf %66, %66 : vector<4x8x128xf32>
      %cst_30 = arith.constant dense<0.000000e+00> : vector<4x8xf32>
      %68 = vector.multi_reduction <add>, %67, %cst_30 [2] : vector<4x8x128xf32> to vector<4x8xf32>
      %69 = vector.shape_cast %68 : vector<4x8xf32> to vector<4x8x1xf32>
      %cst_31 = arith.constant 1.000000e-24 : f32
      %70 = vector.broadcast %cst_31 : f32 to vector<4x8x1xf32>
      %71 = arith.maximumf %69, %70 : vector<4x8x1xf32>
      %72 = math.rsqrt %71 : vector<4x8x1xf32>
      %73 = arith.mulf %72, %72 : vector<4x8x1xf32>
      %74 = arith.mulf %69, %73 : vector<4x8x1xf32>
      %cst_32 = arith.constant dense<0.000000e+00> : vector<4x1xf32>
      %75 = vector.multi_reduction <add>, %74, %cst_32 [1] : vector<4x8x1xf32> to vector<4x1xf32>
      %76 = vector.shape_cast %75 : vector<4x1xf32> to vector<4x1x1xf32>
      %cst_33 = arith.constant 1.000000e-24 : f32
      %77 = vector.broadcast %cst_33 : f32 to vector<4x1x1xf32>
      %78 = arith.maximumf %76, %77 : vector<4x1x1xf32>
      %79 = math.rsqrt %78 : vector<4x1x1xf32>
      %80 = vector.broadcast %79 : vector<4x1x1xf32> to vector<4x8x1xf32>
      %81 = arith.mulf %72, %80 : vector<4x8x1xf32>
      %82 = vector.broadcast %81 : vector<4x8x1xf32> to vector<4x8x128xf32>
      %83 = arith.mulf %66, %82 : vector<4x8x128xf32>
      %84 = tpu.transpose %83, [1, 0, 2] : vector<4x8x128xf32> -> vector<8x4x128xf32>
      %c0_34 = arith.constant 0 : index
      %c0_35 = arith.constant 0 : index
      %c0_36 = arith.constant 0 : index
      %85 = vector.load %arg12[%c0_34, %c0_35, %c0_36] : memref<8x4x128xf32, #tpu.memory_space<vmem>>, vector<8x4x128xf32>
      tpu.vector_store %arg12[%c0_34, %c0_35, %c0_36], %84 {strides = array<i32>} : memref<8x4x128xf32, #tpu.memory_space<vmem>>, vector<8x4x128xf32>,
      %cst_37 = arith.constant 0.000000e+00 : f32
      %86 = vector.broadcast %cst_37 : f32 to vector<4x128xf32>
      %c0_38 = arith.constant 0 : index
      %c0_39 = arith.constant 0 : index
      %87 = vector.load %arg13[%c0_38, %c0_39] : memref<4x128xf32, #tpu.memory_space<vmem>>, vector<4x128xf32>
      tpu.vector_store %arg13[%c0_38, %c0_39], %86 {strides = array<i32>} : memref<4x128xf32, #tpu.memory_space<vmem>>, vector<4x128xf32>,
    } else {
    }
    %c2_i32 = arith.constant 2 : i32
    %3 = arith.muli %arg0, %c2_i32 : i32
    %4 = tpu.assume_multiple %3, 2 : i32
    %5 = arith.index_cast %4 : i32 to index
    %c0 = arith.constant 0 : index
    %c0_1 = arith.constant 0 : index
    %6 = vector.load %arg12[%5, %c0, %c0_1] : memref<8x4x128xf32, #tpu.memory_space<vmem>>, vector<2x4x128xf32>
    %c0_2 = arith.constant 0 : index
    %c0_3 = arith.constant 0 : index
    %c0_4 = arith.constant 0 : index
    %7 = vector.load %arg5[%c0_2, %c0_3, %c0_4] : memref<2x128x128xf32, #tpu.memory_space<vmem>>, vector<2x128x128xf32>
    %c0_5 = arith.constant 0 : index
    %c0_6 = arith.constant 0 : index
    %8 = vector.load %arg13[%c0_5, %c0_6] : memref<4x128xf32, #tpu.memory_space<vmem>>, vector<4x128xf32>
    %9 = vector.extract_strided_slice %6 {offsets = [0, 0, 0], sizes = [1, 4, 128], strides = [1, 1, 1]} : vector<2x4x128xf32> to vector<1x4x128xf32>
    %10 = vector.shape_cast %9 : vector<1x4x128xf32> to vector<4x128xf32>
    %11 = vector.extract_strided_slice %7 {offsets = [0, 0, 0], sizes = [1, 128, 128], strides = [1, 1, 1]} : vector<2x128x128xf32> to vector<1x128x128xf32>
    %12 = vector.shape_cast %11 : vector<1x128x128xf32> to vector<128x128xf32>
    %cst = arith.constant dense<0.000000e+00> : vector<4x128xf32>
    %13 = tpu.matmul %10, %12, %cst {dimension_numbers = #tpu.dot_dimension_numbers<[1], [0], [0], [1], [0, 0, 1, 1], [], []>} : vector<4x128xf32>, vector<128x128xf32>, vector<4x128xf32> -> vector<4x128xf32>
    %14 = arith.addf %8, %13 : vector<4x128xf32>
    %15 = vector.extract_strided_slice %6 {offsets = [1, 0, 0], sizes = [1, 4, 128], strides = [1, 1, 1]} : vector<2x4x128xf32> to vector<1x4x128xf32>
    %16 = vector.shape_cast %15 : vector<1x4x128xf32> to vector<4x128xf32>
    %17 = vector.extract_strided_slice %7 {offsets = [1, 0, 0], sizes = [1, 128, 128], strides = [1, 1, 1]} : vector<2x128x128xf32> to vector<1x128x128xf32>
    %18 = vector.shape_cast %17 : vector<1x128x128xf32> to vector<128x128xf32>
    %cst_7 = arith.constant dense<0.000000e+00> : vector<4x128xf32>
    %19 = tpu.matmul %16, %18, %cst_7 {dimension_numbers = #tpu.dot_dimension_numbers<[1], [0], [0], [1], [0, 0, 1, 1], [], []>} : vector<4x128xf32>, vector<128x128xf32>, vector<4x128xf32> -> vector<4x128xf32>
    %20 = arith.addf %14, %19 : vector<4x128xf32>
    %c0_8 = arith.constant 0 : index
    %c0_9 = arith.constant 0 : index
    %21 = vector.load %arg13[%c0_8, %c0_9] : memref<4x128xf32, #tpu.memory_space<vmem>>, vector<4x128xf32>
    tpu.vector_store %arg13[%c0_8, %c0_9], %20 {strides = array<i32>} : memref<4x128xf32, #tpu.memory_space<vmem>>, vector<4x128xf32>,
    %c3_i32 = arith.constant 3 : i32
    %22 = arith.cmpi eq, %arg0, %c3_i32 : i32
    %23 = arith.extui %22 : i1 to i32
    %c0_i32_10 = arith.constant 0 : i32
    %24 = arith.cmpi ne, %23, %c0_i32_10 : i32
    scf.if %24 {
      %c0_11 = arith.constant 0 : index
      %c0_12 = arith.constant 0 : index
      %25 = vector.load %arg13[%c0_11, %c0_12] : memref<4x128xf32, #tpu.memory_space<vmem>>, vector<4x128xf32>
      %cst_13 = arith.constant dense<0.000000e+00> : vector<128xf32>
      %26 = vector.multi_reduction <add>, %25, %cst_13 [0] : vector<4x128xf32> to vector<128xf32>
      %27 = vector.shape_cast %26 : vector<128xf32> to vector<1x128xf32>
      %cst_14 = arith.constant 2.500000e-01 : f32
      %28 = vector.broadcast %cst_14 : f32 to vector<1x128xf32>
      %29 = arith.mulf %27, %28 : vector<1x128xf32>
      %30 = arith.mulf %25, %25 : vector<4x128xf32>
      %cst_15 = arith.constant dense<0.000000e+00> : vector<128xf32>
      %31 = vector.multi_reduction <add>, %30, %cst_15 [0] : vector<4x128xf32> to vector<128xf32>
      %32 = vector.shape_cast %31 : vector<128xf32> to vector<1x128xf32>
      %cst_16 = arith.constant 2.500000e-01 : f32
      %33 = vector.broadcast %cst_16 : f32 to vector<1x128xf32>
      %34 = arith.mulf %32, %33 : vector<1x128xf32>
      %35 = arith.mulf %29, %29 : vector<1x128xf32>
      %36 = arith.subf %34, %35 : vector<1x128xf32>
      %cst_17 = arith.constant 0.000000e+00 : f32
      %37 = vector.broadcast %cst_17 : f32 to vector<1x128xf32>
      %38 = arith.maximumf %36, %37 : vector<1x128xf32>
      %39 = vector.broadcast %29 : vector<1x128xf32> to vector<4x128xf32>
      %40 = arith.subf %25, %39 : vector<4x128xf32>
      %cst_18 = arith.constant 9.99999974E-6 : f32
      %41 = vector.broadcast %cst_18 : f32 to vector<1x128xf32>
      %42 = arith.addf %38, %41 : vector<1x128xf32>
      %43 = math.rsqrt %42 : vector<1x128xf32>
      %c0_19 = arith.constant 0 : index
      %c0_20 = arith.constant 0 : index
      %44 = vector.load %arg6[%c0_19, %c0_20] : memref<1x128xf32, #tpu.memory_space<vmem>>, vector<1x128xf32>
      %45 = arith.mulf %43, %44 : vector<1x128xf32>
      %46 = vector.broadcast %45 : vector<1x128xf32> to vector<4x128xf32>
      %47 = arith.mulf %40, %46 : vector<4x128xf32>
      %c0_21 = arith.constant 0 : index
      %c0_22 = arith.constant 0 : index
      %48 = vector.load %arg7[%c0_21, %c0_22] : memref<1x128xf32, #tpu.memory_space<vmem>>, vector<1x128xf32>
      %49 = vector.broadcast %48 : vector<1x128xf32> to vector<4x128xf32>
      %50 = arith.addf %47, %49 : vector<4x128xf32>
      %c0_23 = arith.constant 0 : index
      %c0_24 = arith.constant 0 : index
      %51 = vector.load %arg8[%c0_23, %c0_24] : memref<128x128xf32, #tpu.memory_space<vmem>>, vector<128x128xf32>
      %cst_25 = arith.constant dense<0.000000e+00> : vector<4x128xf32>
      %52 = tpu.matmul %50, %51, %cst_25 {dimension_numbers = #tpu.dot_dimension_numbers<[1], [0], [0], [1], [0, 0, 1, 1], [], []>} : vector<4x128xf32>, vector<128x128xf32>, vector<4x128xf32> -> vector<4x128xf32>
      %cst_26 = arith.constant dense<0.000000e+00> : vector<128xf32>
      %53 = vector.multi_reduction <add>, %52, %cst_26 [0] : vector<4x128xf32> to vector<128xf32>
      %54 = vector.shape_cast %53 : vector<128xf32> to vector<1x128xf32>
      %cst_27 = arith.constant 2.500000e-01 : f32
      %55 = vector.broadcast %cst_27 : f32 to vector<1x128xf32>
      %56 = arith.mulf %54, %55 : vector<1x128xf32>
      %57 = arith.mulf %52, %52 : vector<4x128xf32>
      %cst_28 = arith.constant dense<0.000000e+00> : vector<128xf32>
      %58 = vector.multi_reduction <add>, %57, %cst_28 [0] : vector<4x128xf32> to vector<128xf32>
      %59 = vector.shape_cast %58 : vector<128xf32> to vector<1x128xf32>
      %cst_29 = arith.constant 2.500000e-01 : f32
      %60 = vector.broadcast %cst_29 : f32 to vector<1x128xf32>
      %61 = arith.mulf %59, %60 : vector<1x128xf32>
      %62 = arith.mulf %56, %56 : vector<1x128xf32>
      %63 = arith.subf %61, %62 : vector<1x128xf32>
      %cst_30 = arith.constant 0.000000e+00 : f32
      %64 = vector.broadcast %cst_30 : f32 to vector<1x128xf32>
      %65 = arith.maximumf %63, %64 : vector<1x128xf32>
      %66 = vector.broadcast %56 : vector<1x128xf32> to vector<4x128xf32>
      %67 = arith.subf %52, %66 : vector<4x128xf32>
      %cst_31 = arith.constant 9.99999974E-6 : f32
      %68 = vector.broadcast %cst_31 : f32 to vector<1x128xf32>
      %69 = arith.addf %65, %68 : vector<1x128xf32>
      %70 = math.rsqrt %69 : vector<1x128xf32>
      %c0_32 = arith.constant 0 : index
      %c0_33 = arith.constant 0 : index
      %71 = vector.load %arg9[%c0_32, %c0_33] : memref<1x128xf32, #tpu.memory_space<vmem>>, vector<1x128xf32>
      %72 = arith.mulf %70, %71 : vector<1x128xf32>
      %73 = vector.broadcast %72 : vector<1x128xf32> to vector<4x128xf32>
      %74 = arith.mulf %67, %73 : vector<4x128xf32>
      %c0_34 = arith.constant 0 : index
      %c0_35 = arith.constant 0 : index
      %75 = vector.load %arg10[%c0_34, %c0_35] : memref<1x128xf32, #tpu.memory_space<vmem>>, vector<1x128xf32>
      %76 = vector.broadcast %75 : vector<1x128xf32> to vector<4x128xf32>
      %77 = arith.addf %74, %76 : vector<4x128xf32>
      %78 = arith.negf %77 : vector<4x128xf32>
      %79 = math.exp %78 : vector<4x128xf32>
      %cst_36 = arith.constant 1.000000e+00 : f32
      %80 = vector.broadcast %cst_36 : f32 to vector<4x128xf32>
      %81 = arith.addf %80, %79 : vector<4x128xf32>
      %82 = arith.divf %80, %81 : vector<4x128xf32>
      %83 = arith.mulf %50, %82 : vector<4x128xf32>
      %c0_37 = arith.constant 0 : index
      %c0_38 = arith.constant 0 : index
      %84 = vector.load %arg11[%c0_37, %c0_38] : memref<4x128xf32, #tpu.memory_space<vmem>>, vector<4x128xf32>
      tpu.vector_store %arg11[%c0_37, %c0_38], %83 {strides = array<i32>} : memref<4x128xf32, #tpu.memory_space<vmem>>, vector<4x128xf32>,
    } else {
    }
    return
  }
  func.func @transform_0(%arg0: i32) -> (i32, i32, i32) {
    %c0_i32 = arith.constant 0 : i32
    %c0_i32_0 = arith.constant 0 : i32
    %c0_i32_1 = arith.constant 0 : i32
    %c0_i32_2 = arith.constant 0 : i32
    return %c0_i32, %c0_i32_0, %c0_i32_1 : i32, i32, i32
  }
  func.func @transform_1(%arg0: i32) -> (i32, i32) {
    %c0_i32 = arith.constant 0 : i32
    %c0_i32_0 = arith.constant 0 : i32
    %c0_i32_1 = arith.constant 0 : i32
    return %c0_i32, %c0_i32_0 : i32, i32
  }
  func.func @transform_2(%arg0: i32) -> (i32, i32) {
    %c0_i32 = arith.constant 0 : i32
    %c0_i32_0 = arith.constant 0 : i32
    %c0_i32_1 = arith.constant 0 : i32
    return %c0_i32, %c0_i32_0 : i32, i32
  }
  func.func @transform_3(%arg0: i32) -> (i32, i32) {
    %c0_i32 = arith.constant 0 : i32
    %c0_i32_0 = arith.constant 0 : i32
    %c0_i32_1 = arith.constant 0 : i32
    return %c0_i32, %c0_i32_0 : i32, i32
  }
  func.func @transform_4(%arg0: i32) -> (i32, i32, i32) {
    %c0_i32 = arith.constant 0 : i32
    %c0_i32_0 = arith.constant 0 : i32
    %c0_i32_1 = arith.constant 0 : i32
    return %arg0, %c0_i32, %c0_i32_0 : i32, i32, i32
  }
  func.func @transform_5(%arg0: i32) -> (i32, i32) {
    %c0_i32 = arith.constant 0 : i32
    %c0_i32_0 = arith.constant 0 : i32
    %c0_i32_1 = arith.constant 0 : i32
    return %c0_i32, %c0_i32_0 : i32, i32
  }
  func.func @transform_6(%arg0: i32) -> (i32, i32) {
    %c0_i32 = arith.constant 0 : i32
    %c0_i32_0 = arith.constant 0 : i32
    %c0_i32_1 = arith.constant 0 : i32
    return %c0_i32, %c0_i32_0 : i32, i32
  }
  func.func @transform_7(%arg0: i32) -> (i32, i32) {
    %c0_i32 = arith.constant 0 : i32
    %c0_i32_0 = arith.constant 0 : i32
    %c0_i32_1 = arith.constant 0 : i32
    return %c0_i32, %c0_i32_0 : i32, i32
  }
  func.func @transform_8(%arg0: i32) -> (i32, i32) {
    %c0_i32 = arith.constant 0 : i32
    %c0_i32_0 = arith.constant 0 : i32
    %c0_i32_1 = arith.constant 0 : i32
    return %c0_i32, %c0_i32_0 : i32, i32
  }
  func.func @transform_9(%arg0: i32) -> (i32, i32) {
    %c0_i32 = arith.constant 0 : i32
    %c0_i32_0 = arith.constant 0 : i32
    %c0_i32_1 = arith.constant 0 : i32
    return %c0_i32, %c0_i32_0 : i32, i32
  }
  func.func @transform_10(%arg0: i32) -> (i32, i32) {
    %c0_i32 = arith.constant 0 : i32
    %c0_i32_0 = arith.constant 0 : i32
    %c0_i32_1 = arith.constant 0 : i32
    return %c0_i32, %c0_i32_0 : i32, i32
  }
}

</mosaic_0001>

<bundles_post_ra>
// kernel: tpu_custom_call.1
= control target key start
LH: loop header
LB: loop body
LE: loop exit
PB: predicated region body
PF: predicated region fallthrough
CT: control target
= control target key end

     0   :  { %15 = vsyncpa [#allocation5], 0  ;;  %s4309_s0 = inlined_call_operand.hbm [shape: f32[4,64,128], index: 0, kind: input, shape index: {}]   ;;  %s4310_s1 = inlined_call_operand.vmem [shape: f32[128,8], index: 1, kind: input, shape index: {}]   ;;  %s4311_s2 = inlined_call_operand.vmem [shape: f32[1,8], index: 2, kind: input, shape index: {}]   ;;  %s4312_s3 = inlined_call_operand.vmem [shape: f32[1,8], index: 3, kind: input, shape index: {}]   ;;  %s4313_s4 = inlined_call_operand.hbm [shape: f32[8,128,128], index: 4, kind: input, shape index: {}]   ;;  %s4314_s5 = inlined_call_operand.vmem [shape: f32[1,128], index: 5, kind: input, shape index: {}]   ;;  %s4315_s6 = inlined_call_operand.vmem [shape: f32[1,128], index: 6, kind: input, shape index: {}]   ;;  %s4316_s7 = inlined_call_operand.vmem [shape: f32[128,128], index: 7, kind: input, shape index: {}]   ;;  %s4317_s8 = inlined_call_operand.vmem [shape: f32[1,128], index: 8, kind: input, shape index: {}]   ;;  %s4318_s9 = inlined_call_operand.vmem [shape: f32[1,128], index: 9, kind: input, shape index: {}]   ;;  %s4319_s10 = inlined_call_operand.hbm [shape: f32[4,128], index: 10, kind: output, shape index: {}]  }
   0x1   :  { %16 = vsyncpa [#allocation8], 0 }
   0x2   :  { %18 = vsyncpa [#allocation8 + $0x1], 0 }
   0x3   :  { %19 = vsyncpa [#allocation6], 0  ;;  %s3166_s13 = smov 0   ;;  %s3168_s14 = smov 0  }
   0x4   :  { %s3170_s15 = smov 0   ;;  %s3172_s16 = smov 0  }
   0x5 LB: > { %s3185_s17 = sadd.s32 4294967295, %s3096_s16   ;;  %p129_p0 = scmp.ne.s32.totalorder %s3088_s14, %s3084_s13  ;;  %s3096_s16 = sphi %s3172_s16, %s4337_s16   ;;  %s3092_s15 = sphi %s3170_s15, %s4340_s15   ;;  %s3088_s14 = sphi %s3168_s14, %s4339_s14   ;;  %s3084_s13 = sphi %s3166_s13, %s4338_s13  }
   0x6   : > { %p4323_p1 = scmp.eq.s32.totalorder %s3185_s17, 0  ;;  %p2294_p2 = scmp.ge.s32.totalorder %s3096_s16, 1 }
   0x7   : > { %p266_p3 = scmp.lt.s32.totalorder %s3096_s16, 5  ;;  %s3098_s20 = smov [#allocation4]  }
   0x8   : > { %p3194_p5 = por %p4323_p1, %p129_p0  ;;  %s278_s21 = sshll.u32 %s3098_s20, 4  ;;  %s279_s21 = int_to_ptr.vmem [resolvable:$true] %s278_s21 }
   0x9   : > { %p3198_p6 = pnand %p2294_p2, %p266_p3  ;;  %s3211_s23 = sadd.s32 1, %s3096_s16  }
   0xa   : > { %s4326_s18 = scalar_select %p3194_p5, 1, 0 }
   0xb   : > { %s4327_s19 = scalar_select %p3198_p6, 1, 0 }
   0xc   : > { %p2733_p7 = pneg %p3198_p6  ;;  %4329 = sst [smem:[#allocation13_spill]] %s3211_s23 }
   0xd   : > { %s116_s24 = sadd.s32 1, %s3092_s15  ;;  %s113_s25 = ssub.s32 %s3096_s16, %s3211_s23 }
   0xe   : > { %p3206_p8 = pnand %p2733_p7, %p4323_p1  ;;  %s2987_s26 = scalar_lea.vmem %s279_s21, 4096 }
   0xf   : > { %p2988_p10 = scmp.ne.s32.totalorder %s279_s21, %s2987_s26  ;;  %p2995_p13 = scmp.lt.s32.totalorder %s279_s21, %s279_s21 }
  0x10   : > { %p2978_p9 = pneg %p3206_p8  ;;  %p2996_p0 = scmp.lt.s32.totalorder %s2987_s26, %s2987_s26 }
  0x12   : > { %p2990_p11 = pnand %p2988_p10, %p2978_p9  ;;  %p2997_p2 = por %p2996_p0, %p2995_p13 }
  0x14   : > { %p2991_p12 = pneg %p2990_p11 }
  0x16   : > { %p2998_p3 = pnand %p2997_p2, %p2991_p12 }
  0x18   : > { %3001 = shalt.err (!%p2998_p3)
}
  0x19   : > { %s4322_s27 = smov 128   ;;  %s3100_s28 = smov 8  }
  0x1a   : > { %2736 = dma.hbm_to_vmem [thread:$0]  (!%p3206_p8), %s4309_s0, 4096, %s279_s21, [#allocation5], %s4322_s27, %s4322_s27, %s3100_s28  }
  0x1b   : > { %p114_p7 = scmp.eq.s32.totalorder %s113_s25, 0  ;;  %p123_p9 = scmp.ne.s32.totalorder %s3092_s15, %s3088_s14 }
  0x1c   : > { %p124_p10 = scmp.eq.s32.totalorder %s3096_s16, 0  ;;  %p2742_p11 = scmp.lt.s32.totalorder %s3096_s16, 4 }
  0x1d   : > { %s3231_s11 = scalar_select %p114_p7, %s3092_s15, %s116_s24  }
  0x1e   : > { %p125_p12 = por %p124_p10, %p123_p9  ;;  %s316_s12 = sand.u32 1, %s3092_s15  }
  0x1f   : > { %s2297_s13 = sshll.u32 %s316_s12, 8  ;;  %s2325_s20 = sshll.u32 %s3096_s16, 12 }
  0x20   : > { %s3238_s22 = scalar_lea.hbm %s4313_s4, %s2325_s20  ;;  %s320_s29 = scalar_lea.vmem [#allocation7], %s2297_s13 }
  0x21   : > { %s328_s21 = sshll.u32 %s320_s29, 4  ;;  %p3242_p8 = pnand %p2742_p11, %p125_p12  ;;  %s3240_s21 = int_to_ptr.vmem [resolvable:$true] %s328_s21 }
  0x22   : > { %s3246_s24 = scalar_lea.sflag [#allocation8], %s316_s12  ;;  %s3002_s16 = scalar_lea.hbm %s3238_s22, 4096 }
  0x23   : > { %p3003_p13 = scmp.ne.s32.totalorder %s3238_s22, %s3002_s16  ;;  %p3004_p0 = pneg %p3242_p8 }
  0x24   : > { %s3007_s13 = scalar_lea.hbm %s4313_s4, 16384  ;;  %p3008_p7 = scmp.lt.s32.totalorder %s3238_s22, %s4313_s4 }
  0x25   : > { %p3005_p2 = pnand %p3004_p0, %p3003_p13  ;;  %p3009_p9 = scmp.lt.s32.totalorder %s3007_s13, %s3002_s16 }
  0x27   : > { %p3006_p3 = pneg %p3005_p2  ;;  %p3010_p10 = por %p3009_p9, %p3008_p7 }
  0x29   : > { %p3011_p11 = pnand %p3010_p10, %p3006_p3 }
  0x2b   : > { %3014 = shalt.err (!%p3011_p11)
}
  0x2c   : > { %s3015_s12 = scalar_lea.vmem %s3240_s21, 4096  ;;  %s3101_s29 = smov [#allocation7]  }
  0x2d   : > { %p3016_p12 = scmp.ne.s32.totalorder %s3240_s21, %s3015_s12  ;;  %s3020_s27 = sshll.u32 %s3101_s29, 4  ;;  %s3021_s27 = int_to_ptr.vmem [resolvable:$false] %s3020_s27 }
  0x2e   : > { %s3022_s23 = scalar_lea.vmem %s3021_s27, 8192  ;;  %p3023_p2 = scmp.lt.s32.totalorder %s3240_s21, %s3021_s27 }
  0x2f   : > { %p3018_p4 = pnand %p3016_p12, %p3004_p0  ;;  %p3024_p1 = scmp.lt.s32.totalorder %s3022_s23, %s3015_s12 }
  0x31   : > { %p3019_p13 = pneg %p3018_p4  ;;  %p3025_p5 = por %p3024_p1, %p3023_p2 }
  0x33   : > { %p3026_p6 = pnand %p3025_p5, %p3019_p13 }
  0x35   : > { %3029 = shalt.err (!%p3026_p6)
}
  0x36   : > { %s4331_s16 = smov 128   ;;  %p4332_p4 = scmp.ne.s32.totalorder %s4327_s19, 0 }
  0x37   : > { %2740 = dma.hbm_to_vmem [thread:$0]  (!%p3242_p8), %s3238_s22, 4096, %s3240_s21, %s3246_s24, %s4331_s16, %s4331_s16, %s3100_s28  }
  0x38   : > { %340 = sbr.rel (%p4332_p4) target bundleno = 1864 (0x748), region = 60  ;;  %p4333_p0 = scmp.eq.s32.totalorder (!%p4332_p4), %s3185_s17, 0 }
  0x3d   : > { %3071 = dma.done.wait (%p4333_p0), [#allocation5], 4096   ;;  %p4334_p3 = pmov %p4333_p0 }
  0x3e   : > { %s346_s27 = sand.u32 1, %s3088_s14   ;;  %p4335_p1 = scmp.ne.s32.totalorder %s4326_s18, 0 }
  0x3f   : > { %3073 = vsyncadd (%p4334_p3), [#allocation5], 4294963200  ;;  %s2303_s25 = sshll.u32 %s346_s27, 8  ;;  %s347_s30 = scalar_lea.sflag [#allocation8], %s346_s27 }
  0x40   : > { %s3277_s13 = scalar_lea.vmem [#allocation7], %s2303_s25 }
  0x41   : > { %3075 = dma.done.wait (%p4335_p1), %s347_s30, 4096  }
  0x42   : > { %3077 = vsyncadd (%p4335_p1), %s347_s30, 4294963200  ;;  %p4336_p5 = scmp.ne.s32.totalorder %s3185_s17, 0 }
  0x44   : > { %386 = sbr.rel (%p4336_p5) target bundleno = 1292 (0x50c), region = 72 }
  0x49   : > { %v434_v0 = vld [vmem:[%s4310_s1 + $0x78] sm:$0xff]  ;;  %v433_v1 = vld [vmem:[%s4310_s1 + $0x70] sm:$0xff]  ;;  %v432_v2 = vld [vmem:[%s4310_s1 + $0x68] sm:$0xff]  ;;  %vm660_vm0 = vcmask 64512   ;;  %vm3103_vm1 = vmmov 0   ;;  %vm1427_vm2 = vcmask 523264  }
  0x4a   : > { %2462 = vmatprep.subr.mxu0 %v434_v0  ;;  %v431_v3 = vld [vmem:[%s4310_s1 + $0x60] sm:$0xff]  ;;  %v430_v5 = vld [vmem:[%s4310_s1 + $0x58] sm:$0xff]  ;;  %v429_v6 = vld [vmem:[%s4310_s1 + $0x50] sm:$0xff] }
  0x4b   : > { %2463 = vmatpush3.msra.mxu0 %v434_v0  ;;  %v387_v4 = vld [vmem:[#allocation4] sm:$0xff]  ;;  %v426_v9 = vld [vmem:[%s4310_s1 + $0x38] sm:$0xff]  ;;  %v425_v10 = vld [vmem:[%s4310_s1 + $0x30] sm:$0xff] }
  0x4c   : > { %2464 = vmatprep.subr.mxu0 %v433_v1  ;;  %2494 = vmatprep.mubr.f32.mxu0 %v387_v4  ;;  %v428_v7 = vld [vmem:[%s4310_s1 + $0x48] sm:$0xff]  ;;  %v427_v8 = vld [vmem:[%s4310_s1 + $0x40] sm:$0xff]  ;;  %v422_v13 = vld [vmem:[%s4310_s1 + $0x18] sm:$0xff] }
  0x4d   : > { %2465 = vmatpush3.msra.mxu0 %v433_v1  ;;  %v424_v11 = vld [vmem:[%s4310_s1 + $0x28] sm:$0xff]  ;;  %v423_v12 = vld [vmem:[%s4310_s1 + $0x20] sm:$0xff]  ;;  %v421_v14 = vld [vmem:[%s4310_s1 + $0x10] sm:$0xff] }
  0x4e   : > { %2466 = vmatprep.subr.mxu0 %v432_v2  ;;  %v420_v15 = vld [vmem:[%s4310_s1 + $0x8] sm:$0xff]  ;;  %v419_v16 = vld [vmem:[%s4310_s1] sm:$0xff]  ;;  %v389_v18 = vld [vmem:[#allocation4 + $0x10] sm:$0xff] }
  0x4f   : > { %2467 = vmatpush3.msra.mxu0 %v432_v2  ;;  %v388_v17 = vld [vmem:[#allocation4 + $0x8] sm:$0xff]  ;;  %v390_v19 = vld [vmem:[#allocation4 + $0x18] sm:$0xff]  ;;  %v391_v20 = vld [vmem:[#allocation4 + $0x20] sm:$0xff] }
  0x50   : > { %2468 = vmatprep.subr.mxu0 %v431_v3  ;;  %v392_v21 = vld [vmem:[#allocation4 + $0x28] sm:$0xff]  ;;  %v393_v22 = vld [vmem:[#allocation4 + $0x30] sm:$0xff]  ;;  %v394_v23 = vld [vmem:[#allocation4 + $0x38] sm:$0xff] }
  0x51   : > { %2469 = vmatpush3.msra.mxu0 %v431_v3  ;;  %v395_v24 = vld [vmem:[#allocation4 + $0x40] sm:$0xff]  ;;  %v396_v25 = vld [vmem:[#allocation4 + $0x48] sm:$0xff]  ;;  %v397_v26 = vld [vmem:[#allocation4 + $0x50] sm:$0xff] }
  0x52   : > { %2470 = vmatprep.subr.mxu0 %v430_v5  ;;  %v398_v27 = vld [vmem:[#allocation4 + $0x58] sm:$0xff]  ;;  %v399_v28 = vld [vmem:[#allocation4 + $0x60] sm:$0xff]  ;;  %v400_v29 = vld [vmem:[#allocation4 + $0x68] sm:$0xff] }
  0x53   : > { %2471 = vmatpush3.msra.mxu0 %v430_v5  ;;  %v401_v30 = vld [vmem:[#allocation4 + $0x70] sm:$0xff]  ;;  %v402_v31 = vld [vmem:[#allocation4 + $0x78] sm:$0xff]  ;;  %v403_v32 = vld [vmem:[#allocation4 + $0x80] sm:$0xff] }
  0x54   : > { %2472 = vmatprep.subr.mxu0 %v429_v6  ;;  %v404_v33 = vld [vmem:[#allocation4 + $0x88] sm:$0xff]  ;;  %v405_v34 = vld [vmem:[#allocation4 + $0x90] sm:$0xff]  ;;  %v406_v35 = vld [vmem:[#allocation4 + $0x98] sm:$0xff] }
  0x55   : > { %2473 = vmatpush3.msra.mxu0 %v429_v6  ;;  %v407_v36 = vld [vmem:[#allocation4 + $0xa0] sm:$0xff]  ;;  %v408_v37 = vld [vmem:[#allocation4 + $0xa8] sm:$0xff]  ;;  %v409_v38 = vld [vmem:[#allocation4 + $0xb0] sm:$0xff] }
  0x56   : > { %2474 = vmatprep.subr.mxu0 %v428_v7  ;;  %v410_v39 = vld [vmem:[#allocation4 + $0xb8] sm:$0xff]  ;;  %v411_v40 = vld [vmem:[#allocation4 + $0xc0] sm:$0xff]  ;;  %v412_v41 = vld [vmem:[#allocation4 + $0xc8] sm:$0xff] }
  0x57   : > { %2475 = vmatpush3.msra.mxu0 %v428_v7  ;;  %v413_v42 = vld [vmem:[#allocation4 + $0xd0] sm:$0xff]  ;;  %v414_v43 = vld [vmem:[#allocation4 + $0xd8] sm:$0xff]  ;;  %v415_v44 = vld [vmem:[#allocation4 + $0xe0] sm:$0xff] }
  0x58   : > { %2476 = vmatprep.subr.mxu0 %v427_v8  ;;  %v416_v45 = vld [vmem:[#allocation4 + $0xe8] sm:$0xff]  ;;  %v417_v46 = vld [vmem:[#allocation4 + $0xf0] sm:$0xff]  ;;  %v418_v47 = vld [vmem:[#allocation4 + $0xf8] sm:$0xff] }
  0x59   : > { %2477 = vmatpush3.msra.mxu0 %v427_v8 }
  0x5a   : > { %2478 = vmatprep.subr.mxu0 %v426_v9 }
  0x5b   : > { %2479 = vmatpush3.msra.mxu0 %v426_v9 }
  0x5c   : > { %2480 = vmatprep.subr.mxu0 %v425_v10 }
  0x5d   : > { %2481 = vmatpush3.msra.mxu0 %v425_v10 }
  0x5e   : > { %2482 = vmatprep.subr.mxu0 %v424_v11 }
  0x5f   : > { %2483 = vmatpush3.msra.mxu0 %v424_v11 }
  0x60   : > { %2484 = vmatprep.subr.mxu0 %v423_v12 }
  0x61   : > { %2485 = vmatpush3.msra.mxu0 %v423_v12 }
  0x62   : > { %2486 = vmatprep.subr.mxu0 %v422_v13 }
  0x63   : > { %2487 = vmatpush3.msra.mxu0 %v422_v13 }
  0x64   : > { %2488 = vmatprep.subr.mxu0 %v421_v14 }
  0x65   : > { %2489 = vmatpush3.msra.mxu0 %v421_v14 }
  0x66   : > { %2490 = vmatprep.subr.mxu0 %v420_v15 }
  0x67   : > { %2491 = vmatpush3.msra.mxu0 %v420_v15 }
  0x68   : > { %2492 = vmatprep.subr.mxu0 %v419_v16 }
  0x69   : > { %2493 = vmatpush3.msra.mxu0 %v419_v16 }
  0x6a   : > { %2495 = vmatmul.mubr.f32.vlgmr.msra.gmra.mxu0 %v388_v17 }
  0x6b   : > { %2497 = vmatprep.mubr.f32.mxu0 %v389_v18 }
  0x6e   : > { %2498 = vmatmul.mubr.f32.gmra.mxu0 %v390_v19 }
  0x6f   : > { %2500 = vmatprep.mubr.f32.mxu0 %v391_v20 }
  0x72   : > { %2501 = vmatmul.mubr.f32.gmra.mxu0 %v392_v21 }
  0x73   : > { %2503 = vmatprep.mubr.f32.mxu0 %v393_v22 }
  0x76   : > { %2504 = vmatmul.mubr.f32.gmra.mxu0 %v394_v23 }
  0x77   : > { %2506 = vmatprep.mubr.f32.mxu0 %v395_v24 }
  0x7a   : > { %2507 = vmatmul.mubr.f32.gmra.mxu0 %v396_v25 }
  0x7b   : > { %2509 = vmatprep.mubr.f32.mxu0 %v397_v26 }
  0x7e   : > { %2510 = vmatmul.mubr.f32.gmra.mxu0 %v398_v27 }
  0x7f   : > { %2512 = vmatprep.mubr.f32.mxu0 %v399_v28 }
  0x82   : > { %2513 = vmatmul.mubr.f32.gmra.mxu0 %v400_v29 }
  0x83   : > { %2515 = vmatprep.mubr.f32.mxu0 %v401_v30 }
  0x86   : > { %2516 = vmatmul.mubr.f32.gmra.mxu0 %v402_v31 }
  0x87   : > { %2518 = vmatprep.mubr.f32.mxu0 %v403_v32 }
  0x8a   : > { %2519 = vmatmul.mubr.f32.gmra.mxu0 %v404_v33 }
  0x8b   : > { %2521 = vmatprep.mubr.f32.mxu0 %v405_v34 }
  0x8e   : > { %2522 = vmatmul.mubr.f32.gmra.mxu0 %v406_v35 }
  0x8f   : > { %2524 = vmatprep.mubr.f32.mxu0 %v407_v36 }
  0x92   : > { %2525 = vmatmul.mubr.f32.gmra.mxu0 %v408_v37 }
  0x93   : > { %2527 = vmatprep.mubr.f32.mxu0 %v409_v38 }
  0x96   : > { %2528 = vmatmul.mubr.f32.gmra.mxu0 %v410_v39 }
  0x97   : > { %2530 = vmatprep.mubr.f32.mxu0 %v411_v40 }
  0x9a   : > { %2531 = vmatmul.mubr.f32.gmra.mxu0 %v412_v41 }
  0x9b   : > { %2533 = vmatprep.mubr.f32.mxu0 %v413_v42 }
  0x9e   : > { %2534 = vmatmul.mubr.f32.gmra.mxu0 %v414_v43 }
  0x9f   : > { %2536 = vmatprep.mubr.f32.mxu0 %v415_v44 }
  0xa2   : > { %2537 = vmatmul.mubr.f32.gmra.mxu0 %v416_v45 }
  0xa3   : > { %2539 = vmatprep.mubr.f32.mxu0 %v417_v46 }
  0xa6   : > { %2540 = vmatmul.mubr.f32.gmra.mxu0 %v418_v47 }
 0x12a   : > { %v3333_v48 = vpop.f32.mrf.mxu0 }
 0x12b   : > { %v732_v50 = vmul.f32 %v3333_v48, %v3333_v48  ;;  %v662_v54 = vsel %vm660_vm0, %v3333_v48, 0.0 }
 0x12c   : > { %v3335_v49 = vpop.f32.mrf.mxu0 }
 0x12d   : > { %v661_v51 = vsel %vm660_vm0, %v3335_v49, 0.0  ;;  %v731_v52 = vmul.f32 %v3335_v49, %v3335_v49  ;;  %v764_v58 = vsel %vm660_vm0, %v732_v50, 0.0 }
 0x12e   : > { %v3343_v53 = vpop.f32.mrf.mxu0  ;;  %v663_v56 = vadd.f32 %v662_v54, %v661_v51 }
 0x12f   : > { %v763_v55 = vsel %vm660_vm0, %v731_v52, 0.0  ;;  %v734_v59 = vmul.f32 %v3343_v53, %v3343_v53  ;;  %v666_v1 = vsel %vm660_vm0, %v3343_v53, 0.0 }
 0x130   : > { %v3348_v57 = vpop.f32.mrf.mxu0  ;;  %v765_v62 = vadd.f32 %v764_v58, %v763_v55 }
 0x131   : > { %v664_v60 = vsel %vm660_vm0, %v3348_v57, 0.0  ;;  %v733_v61 = vmul.f32 %v3348_v57, %v3348_v57  ;;  %v768_v6 = vsel %vm660_vm0, %v734_v59, 0.0 }
 0x132   : > { %v665_v63 = vadd.f32 %v664_v60, %v663_v56  ;;  %v3357_v0 = vpop.f32.mrf.mxu0 }
 0x133   : > { %v766_v2 = vsel %vm660_vm0, %v733_v61, 0.0  ;;  %v736_v7 = vmul.f32 %v3357_v0, %v3357_v0  ;;  %v670_v13 = vsel %vm660_vm0, %v3357_v0, 0.0 }
 0x134   : > { %v767_v3 = vadd.f32 %v766_v2, %v765_v62  ;;  %v3362_v4 = vpop.f32.mrf.mxu0  ;;  %v667_v5 = vadd.f32 %v666_v1, %v665_v63 }
 0x135   : > { %v668_v8 = vsel %vm660_vm0, %v3362_v4, 0.0  ;;  %v735_v9 = vmul.f32 %v3362_v4, %v3362_v4  ;;  %v772_v18 = vsel %vm660_vm0, %v736_v7, 0.0 }
 0x136   : > { %v669_v10 = vadd.f32 %v668_v8, %v667_v5  ;;  %v769_v11 = vadd.f32 %v768_v6, %v767_v3  ;;  %v3371_v12 = vpop.f32.mrf.mxu0 }
 0x137   : > { %v770_v14 = vsel %vm660_vm0, %v735_v9, 0.0  ;;  %v738_v19 = vmul.f32 %v3371_v12, %v3371_v12  ;;  %v674_v25 = vsel %vm660_vm0, %v3371_v12, 0.0 }
 0x138   : > { %v771_v15 = vadd.f32 %v770_v14, %v769_v11  ;;  %v3376_v16 = vpop.f32.mrf.mxu0  ;;  %v671_v17 = vadd.f32 %v670_v13, %v669_v10 }
 0x139   : > { %v672_v20 = vsel %vm660_vm0, %v3376_v16, 0.0  ;;  %v737_v21 = vmul.f32 %v3376_v16, %v3376_v16  ;;  %v776_v30 = vsel %vm660_vm0, %v738_v19, 0.0 }
 0x13a   : > { %v673_v22 = vadd.f32 %v672_v20, %v671_v17  ;;  %v773_v23 = vadd.f32 %v772_v18, %v771_v15  ;;  %v3385_v24 = vpop.f32.mrf.mxu0 }
 0x13b   : > { %v774_v26 = vsel %vm660_vm0, %v737_v21, 0.0  ;;  %v740_v31 = vmul.f32 %v3385_v24, %v3385_v24  ;;  %v678_v37 = vsel %vm660_vm0, %v3385_v24, 0.0 }
 0x13c   : > { %v775_v27 = vadd.f32 %v774_v26, %v773_v23  ;;  %v3390_v28 = vpop.f32.mrf.mxu0  ;;  %v675_v29 = vadd.f32 %v674_v25, %v673_v22 }
 0x13d   : > { %v676_v32 = vsel %vm660_vm0, %v3390_v28, 0.0  ;;  %v739_v33 = vmul.f32 %v3390_v28, %v3390_v28  ;;  %v780_v42 = vsel %vm660_vm0, %v740_v31, 0.0 }
 0x13e   : > { %v677_v34 = vadd.f32 %v676_v32, %v675_v29  ;;  %v777_v35 = vadd.f32 %v776_v30, %v775_v27  ;;  %v3399_v36 = vpop.f32.mrf.mxu0 }
 0x13f   : > { %v778_v38 = vsel %vm660_vm0, %v739_v33, 0.0  ;;  %v742_v43 = vmul.f32 %v3399_v36, %v3399_v36  ;;  %v682_v51 = vsel %vm660_vm0, %v3399_v36, 0.0 }
 0x140   : > { %v779_v39 = vadd.f32 %v778_v38, %v777_v35  ;;  %v3404_v40 = vpop.f32.mrf.mxu0  ;;  %v679_v41 = vadd.f32 %v678_v37, %v677_v34 }
 0x141   : > { %v680_v44 = vsel %vm660_vm0, %v3404_v40, 0.0  ;;  %v741_v45 = vmul.f32 %v3404_v40, %v3404_v40  ;;  %v784_v58 = vsel %vm660_vm0, %v742_v43, 0.0 }
 0x142   : > { %v681_v46 = vadd.f32 %v680_v44, %v679_v41  ;;  %v781_v47 = vadd.f32 %v780_v42, %v779_v39  ;;  %v3413_v50 = vpop.f32.mrf.mxu0 }
 0x143   : > { %v782_v52 = vsel %vm660_vm0, %v741_v45, 0.0  ;;  %v744_v59 = vmul.f32 %v3413_v50, %v3413_v50  ;;  %v686_v2 = vsel %vm660_vm0, %v3413_v50, 0.0 }
 0x144   : > { %v783_v54 = vadd.f32 %v782_v52, %v781_v47  ;;  %v3418_v55 = vpop.f32.mrf.mxu0  ;;  %v683_v56 = vadd.f32 %v682_v51, %v681_v46 }
 0x145   : > { %v684_v60 = vsel %vm660_vm0, %v3418_v55, 0.0  ;;  %v743_v61 = vmul.f32 %v3418_v55, %v3418_v55  ;;  %v788_v8 = vsel %vm660_vm0, %v744_v59, 0.0 }
 0x146   : > { %v685_v62 = vadd.f32 %v684_v60, %v683_v56  ;;  %v785_v63 = vadd.f32 %v784_v58, %v783_v54  ;;  %v3427_v1 = vpop.f32.mrf.mxu0 }
 0x147   : > { %v786_v3 = vsel %vm660_vm0, %v743_v61, 0.0  ;;  %v746_v9 = vmul.f32 %v3427_v1, %v3427_v1  ;;  %v690_v17 = vsel %vm660_vm0, %v3427_v1, 0.0 }
 0x148   : > { %v787_v5 = vadd.f32 %v786_v3, %v785_v63  ;;  %v3432_v6 = vpop.f32.mrf.mxu0  ;;  %v687_v7 = vadd.f32 %v686_v2, %v685_v62 }
 0x149   : > { %v688_v10 = vsel %vm660_vm0, %v3432_v6, 0.0  ;;  %v745_v11 = vmul.f32 %v3432_v6, %v3432_v6  ;;  %v792_v22 = vsel %vm660_vm0, %v746_v9, 0.0 }
 0x14a   : > { %v689_v13 = vadd.f32 %v688_v10, %v687_v7  ;;  %v789_v14 = vadd.f32 %v788_v8, %v787_v5  ;;  %v3441_v15 = vpop.f32.mrf.mxu0 }
 0x14b   : > { %v790_v18 = vsel %vm660_vm0, %v745_v11, 0.0  ;;  %v748_v23 = vmul.f32 %v3441_v15, %v3441_v15  ;;  %v694_v31 = vsel %vm660_vm0, %v3441_v15, 0.0 }
 0x14c   : > { %v791_v19 = vadd.f32 %v790_v18, %v789_v14  ;;  %v3446_v20 = vpop.f32.mrf.mxu0  ;;  %v691_v21 = vadd.f32 %v690_v17, %v689_v13 }
 0x14d   : > { %v692_v25 = vsel %vm660_vm0, %v3446_v20, 0.0  ;;  %v747_v26 = vmul.f32 %v3446_v20, %v3446_v20  ;;  %v796_v37 = vsel %vm660_vm0, %v748_v23, 0.0 }
 0x14e   : > { %v693_v27 = vadd.f32 %v692_v25, %v691_v21  ;;  %v793_v29 = vadd.f32 %v792_v22, %v791_v19  ;;  %v3455_v30 = vpop.f32.mrf.mxu0 }
 0x14f   : > { %v794_v32 = vsel %vm660_vm0, %v747_v26, 0.0  ;;  %v750_v38 = vmul.f32 %v3455_v30, %v3455_v30  ;;  %v698_v45 = vsel %vm660_vm0, %v3455_v30, 0.0 }
 0x150   : > { %v795_v33 = vadd.f32 %v794_v32, %v793_v29  ;;  %v3460_v34 = vpop.f32.mrf.mxu0  ;;  %v695_v35 = vadd.f32 %v694_v31, %v693_v27 }
 0x151   : > { %v696_v39 = vsel %vm660_vm0, %v3460_v34, 0.0  ;;  %v749_v41 = vmul.f32 %v3460_v34, %v3460_v34  ;;  %v800_v54 = vsel %vm660_vm0, %v750_v38, 0.0 }
 0x152   : > { %v697_v42 = vadd.f32 %v696_v39, %v695_v35  ;;  %v797_v43 = vadd.f32 %v796_v37, %v795_v33  ;;  %v3469_v44 = vpop.f32.mrf.mxu0 }
 0x153   : > { %v798_v46 = vsel %vm660_vm0, %v749_v41, 0.0  ;;  %v752_v56 = vmul.f32 %v3469_v44, %v3469_v44  ;;  %v702_v63 = vsel %vm660_vm0, %v3469_v44, 0.0 }
 0x154   : > { %v799_v47 = vadd.f32 %v798_v46, %v797_v43  ;;  %v3474_v51 = vpop.f32.mrf.mxu0  ;;  %v699_v52 = vadd.f32 %v698_v45, %v697_v42 }
 0x155   : > { %v700_v58 = vsel %vm660_vm0, %v3474_v51, 0.0  ;;  %v751_v59 = vmul.f32 %v3474_v51, %v3474_v51  ;;  %v804_v8 = vsel %vm660_vm0, %v752_v56, 0.0 }
 0x156   : > { %v701_v60 = vadd.f32 %v700_v58, %v699_v52  ;;  %v801_v61 = vadd.f32 %v800_v54, %v799_v47  ;;  %v3483_v62 = vpop.f32.mrf.mxu0 }
 0x157   : > { %v802_v2 = vsel %vm660_vm0, %v751_v59, 0.0  ;;  %v754_v9 = vmul.f32 %v3483_v62, %v3483_v62  ;;  %v706_v18 = vsel %vm660_vm0, %v3483_v62, 0.0 }
 0x158   : > { %v803_v3 = vadd.f32 %v802_v2, %v801_v61  ;;  %v3488_v5 = vpop.f32.mrf.mxu0  ;;  %v703_v7 = vadd.f32 %v702_v63, %v701_v60 }
 0x159   : > { %v704_v10 = vsel %vm660_vm0, %v3488_v5, 0.0  ;;  %v753_v11 = vmul.f32 %v3488_v5, %v3488_v5  ;;  %v808_v25 = vsel %vm660_vm0, %v754_v9, 0.0 }
 0x15a   : > { %v705_v13 = vadd.f32 %v704_v10, %v703_v7  ;;  %v805_v14 = vadd.f32 %v804_v8, %v803_v3  ;;  %v3497_v17 = vpop.f32.mrf.mxu0 }
 0x15b   : > { %v806_v19 = vsel %vm660_vm0, %v753_v11, 0.0  ;;  %v756_v26 = vmul.f32 %v3497_v17, %v3497_v17  ;;  %v710_v35 = vsel %vm660_vm0, %v3497_v17, 0.0 }
 0x15c   : > { %v807_v21 = vadd.f32 %v806_v19, %v805_v14  ;;  %v3502_v22 = vpop.f32.mrf.mxu0  ;;  %v707_v23 = vadd.f32 %v706_v18, %v705_v13 }
 0x15d   : > { %v708_v27 = vsel %vm660_vm0, %v3502_v22, 0.0  ;;  %v755_v29 = vmul.f32 %v3502_v22, %v3502_v22  ;;  %v812_v42 = vsel %vm660_vm0, %v756_v26, 0.0 }
 0x15e   : > { %v709_v31 = vadd.f32 %v708_v27, %v707_v23  ;;  %v809_v32 = vadd.f32 %v808_v25, %v807_v21  ;;  %v3511_v33 = vpop.f32.mrf.mxu0 }
 0x15f   : > { %v810_v37 = vsel %vm660_vm0, %v755_v29, 0.0  ;;  %v758_v43 = vmul.f32 %v3511_v33, %v3511_v33  ;;  %v714_v56 = vsel %vm660_vm0, %v3511_v33, 0.0 }
 0x160   : > { %v811_v38 = vadd.f32 %v810_v37, %v809_v32  ;;  %v3516_v39 = vpop.f32.mrf.mxu0  ;;  %v711_v41 = vadd.f32 %v710_v35, %v709_v31 }
 0x161   : > { %v712_v45 = vsel %vm660_vm0, %v3516_v39, 0.0  ;;  %v757_v46 = vmul.f32 %v3516_v39, %v3516_v39  ;;  %v816_v63 = vsel %vm660_vm0, %v758_v43, 0.0 }
 0x162   : > { %v713_v47 = vadd.f32 %v712_v45, %v711_v41  ;;  %v813_v52 = vadd.f32 %v812_v42, %v811_v38  ;;  %v3525_v54 = vpop.f32.mrf.mxu0 }
 0x163   : > { %v814_v58 = vsel %vm660_vm0, %v757_v46, 0.0  ;;  %v760_v2 = vmul.f32 %v3525_v54, %v3525_v54  ;;  %v718_v11 = vsel %vm660_vm0, %v3525_v54, 0.0 }
 0x164   : > { %v815_v59 = vadd.f32 %v814_v58, %v813_v52  ;;  %v3530_v60 = vpop.f32.mrf.mxu0  ;;  %v715_v61 = vadd.f32 %v714_v56, %v713_v47 }
 0x165   : > { %v716_v3 = vsel %vm660_vm0, %v3530_v60, 0.0  ;;  %v759_v7 = vmul.f32 %v3530_v60, %v3530_v60  ;;  %v820_v21 = vsel %vm660_vm0, %v760_v2, 0.0 }
 0x166   : > { %v717_v8 = vadd.f32 %v716_v3, %v715_v61  ;;  %v817_v9 = vadd.f32 %v816_v63, %v815_v59  ;;  %v3539_v10 = vpop.f32.mrf.mxu0 }
 0x167   : > { %v818_v13 = vsel %vm660_vm0, %v759_v7, 0.0  ;;  %v762_v23 = vmul.f32 %v3539_v10, %v3539_v10  ;;  %v722_v31 = vsel %vm660_vm0, %v3539_v10, 0.0 }
 0x168   : > { %v819_v14 = vadd.f32 %v818_v13, %v817_v9  ;;  %v3544_v18 = vpop.f32.mrf.mxu0  ;;  %v719_v19 = vadd.f32 %v718_v11, %v717_v8 }
 0x169   : > { %v720_v25 = vsel %vm660_vm0, %v3544_v18, 0.0  ;;  %v761_v26 = vmul.f32 %v3544_v18, %v3544_v18  ;;  %v824_v38 = vsel %vm660_vm0, %v762_v23, 0.0 }
 0x16a   : > { %v721_v27 = vadd.f32 %v720_v25, %v719_v19  ;;  %v821_v29 = vadd.f32 %v820_v21, %v819_v14 }
 0x16b   : > { %v822_v32 = vsel %vm660_vm0, %v761_v26, 0.0 }
 0x16c   : > { %v723_v35 = vadd.f32 %v722_v31, %v721_v27  ;;  %v823_v37 = vadd.f32 %v822_v32, %v821_v29 }
 0x16e   : > { %v724_v41 = vrot.slane %v723_v35, 4  ;;  %v825_v42 = vadd.f32 %v824_v38, %v823_v37  ;;  %v872_v38 = vlaneseq }
 0x170   : > { %v725_v43 = vadd.f32 %v724_v41, %v723_v35  ;;  %v826_v45 = vrot.slane %v825_v42, 4  ;;  %v3585_v41 = vshrl.u32 %v872_v38, 7 }
 0x172   : > { %v726_v46 = vrot.slane %v725_v43, 2  ;;  %v827_v47 = vadd.f32 %v826_v45, %v825_v42  ;;  %v870_v42 = vld [vmem:[%s4311_s2] sm:$0x1] }
 0x174   : > { %v727_v52 = vadd.f32 %v726_v46, %v725_v43  ;;  %v828_v56 = vrot.slane %v827_v47, 2  ;;  %v874_v43 = vsub.s32 0, %v3585_v41 }
 0x176   : > { %v728_v58 = vrot.slane %v727_v52, 1  ;;  %v829_v59 = vadd.f32 %v828_v56, %v827_v47 }
 0x178   : > { %v729_v61 = vadd.f32 %v728_v58, %v727_v52  ;;  %v830_v63 = vrot.slane %v829_v59, 1 }
 0x17a   : > { %v3557_v2 = vmul.f32 0.00390625, %v729_v61  ;;  %v831_v3 = vadd.f32 %v830_v63, %v829_v59  ;;  %v3604_v61 = vld [vmem:[%s4312_s3] ss:$0 sm:$0xff] }
 0x17c   : > { %v832_v7 = vmul.f32 0.00390625, %v831_v3  ;;  %v833_v8 = vmul.f32 %v3557_v2, %v3557_v2  ;;  %v866_v9 = vsub.f32 %v3544_v18, %v3557_v2  ;;  %v856_v19 = vsub.f32 %v3474_v51, %v3557_v2 }
 0x17d   : > { %v857_v21 = vsub.f32 %v3469_v44, %v3557_v2  ;;  %v858_v23 = vsub.f32 %v3488_v5, %v3557_v2  ;;  %v859_v25 = vsub.f32 %v3483_v62, %v3557_v2  ;;  %v860_v26 = vsub.f32 %v3502_v22, %v3557_v2 }
 0x17e   : > { %v834_v11 = vsub.f32 %v832_v7, %v833_v8  ;;  %v861_v27 = vsub.f32 %v3497_v17, %v3557_v2  ;;  %v862_v29 = vsub.f32 %v3516_v39, %v3557_v2  ;;  %v863_v31 = vsub.f32 %v3511_v33, %v3557_v2 }
 0x17f   : > { %v864_v32 = vsub.f32 %v3530_v60, %v3557_v2  ;;  %v865_v35 = vsub.f32 %v3525_v54, %v3557_v2  ;;  %v867_v37 = vsub.f32 %v3539_v10, %v3557_v2  ;;  %v836_v52 = vsub.f32 %v3335_v49, %v3557_v2 }
 0x180   : > { %v835_v13 = vmax.f32 %v834_v11, 0.0  ;;  %v838_v56 = vsub.f32 %v3348_v57, %v3557_v2  ;;  %v839_v58 = vsub.f32 %v3343_v53, %v3557_v2  ;;  %v837_v59 = vsub.f32 %v3333_v48, %v3557_v2 }
 0x181   : > { %v840_v57 = vsub.f32 %v3362_v4, %v3557_v2  ;;  %v841_v53 = vsub.f32 %v3357_v0, %v3557_v2 }
 0x182   : > { %v868_v14 = vadd.f32 1e-05, %v835_v13 }
 0x184   : > { %2790 = vrsqrt.f32 %v868_v14 }
 0x191   : > { %v2791_v45 = vpop.eup %2790 }
 0x192   : > { %v871_v46 = vmul.f32 %v2791_v45, %v870_v42  ;;  %v842_v42 = vsub.f32 %v3376_v16, %v3557_v2 }
 0x194   : > { %v3591_v47 = vrot.slane %v871_v46, %v874_v43  ;;  %v843_v43 = vsub.f32 %v3371_v12, %v3557_v2  ;;  %v844_v12 = vsub.f32 %v3390_v28, %v3557_v2  ;;  %v847_v28 = vsub.f32 %v3399_v36, %v3557_v2 }
 0x195   : > { %v849_v36 = vsub.f32 %v3413_v50, %v3557_v2  ;;  %v851_v50 = vsub.f32 %v3427_v1, %v3557_v2 }
 0x196   : > { %v878_v63 = vmul.f32 %v3591_v47, %v838_v56  ;;  %v876_v3 = vmul.f32 %v3591_v47, %v836_v52  ;;  %v879_v49 = vmul.f32 %v3591_v47, %v839_v58  ;;  %v877_v7 = vmul.f32 %v3591_v47, %v837_v59 }
 0x197   : > { %v881_v11 = vmul.f32 %v3591_v47, %v841_v53  ;;  %v880_v13 = vmul.f32 %v3591_v47, %v840_v57  ;;  %v883_v45 = vmul.f32 %v3591_v47, %v843_v43  ;;  %v882_v46 = vmul.f32 %v3591_v47, %v842_v42 }
 0x198   : > { %v3615_v48 = vadd.f32 %v3604_v61, %v878_v63  ;;  %v3618_v8 = vadd.f32 %v3604_v61, %v876_v3  ;;  %v3627_v0 = vadd.f32 %v3604_v61, %v879_v49  ;;  %v3630_v38 = vadd.f32 %v3604_v61, %v877_v7 }
 0x199   : > { %v3643_v58 = vadd.f32 %v3604_v61, %v881_v11  ;;  %v3646_v16 = vadd.f32 %v3604_v61, %v880_v13  ;;  %v845_v59 = vsub.f32 %v3385_v24, %v3557_v2  ;;  %v3653_v63 = vadd.f32 %v3604_v61, %v883_v45 }
 0x19a   : > { %v953_v14 = vsel %vm660_vm0, %v3615_v48, -inf  ;;  %v947_v4 = vsel %vm660_vm0, %v3618_v8, -inf  ;;  %v956_v52 = vsel %vm660_vm0, %v3627_v0, -inf  ;;  %v950_v56 = vsel %vm660_vm0, %v3630_v38, -inf }
 0x19b   : > { %954 = vmax.xlane.f32.xlu1 %v953_v14  ;;  %948 = vmax.xlane.f32.xlu0 %v947_v4  ;;  %v3656_v3 = vadd.f32 %v3604_v61, %v882_v46  ;;  %v962_v49 = vsel %vm660_vm0, %v3643_v58, -inf  ;;  %v959_v57 = vsel %vm660_vm0, %v3646_v16, -inf  ;;  %v885_v53 = vmul.f32 %v3591_v47, %v845_v59 }
 0x19c   : > { %v884_v7 = vmul.f32 %v3591_v47, %v844_v12  ;;  %v846_v24 = vsub.f32 %v3404_v40, %v3557_v2  ;;  %v968_v11 = vsel %vm660_vm0, %v3653_v63, -inf  ;;  %v887_v42 = vmul.f32 %v3591_v47, %v847_v28 }
 0x19d   : > { %v965_v13 = vsel %vm660_vm0, %v3656_v3, -inf  ;;  %v3673_v14 = vadd.f32 %v3604_v61, %v885_v53  ;;  %v848_v40 = vsub.f32 %v3418_v55, %v3557_v2  ;;  %v889_v45 = vmul.f32 %v3591_v47, %v849_v36 }
 0x19e   : > { %v3676_v4 = vadd.f32 %v3604_v61, %v884_v7  ;;  %v886_v43 = vmul.f32 %v3591_v47, %v846_v24  ;;  %v3691_v12 = vadd.f32 %v3604_v61, %v887_v42  ;;  %v850_v59 = vsub.f32 %v3432_v6, %v3557_v2 }
 0x19f   : > { %957 = vmax.xlane.f32.xlu1 %v956_v52  ;;  %951 = vmax.xlane.f32.xlu0 %v950_v56  ;;  %v888_v46 = vmul.f32 %v3591_v47, %v848_v40  ;;  %v974_v52 = vsel %vm660_vm0, %v3673_v14, -inf  ;;  %v852_v6 = vsub.f32 %v3446_v20, %v3557_v2  ;;  %v853_v28 = vsub.f32 %v3441_v15, %v3557_v2 }
 0x1a0   : > { %v971_v56 = vsel %vm660_vm0, %v3676_v4, -inf  ;;  %v3694_v55 = vadd.f32 %v3604_v61, %v886_v43  ;;  %v980_v53 = vsel %vm660_vm0, %v3691_v12, -inf  ;;  %v890_v1 = vmul.f32 %v3591_v47, %v850_v59 }
 0x1a1   : > { %v3709_v24 = vadd.f32 %v3604_v61, %v888_v46  ;;  %v893_v40 = vmul.f32 %v3591_v47, %v853_v28  ;;  %v892_v36 = vmul.f32 %v3591_v47, %v852_v6  ;;  %v855_v20 = vsub.f32 %v3455_v30, %v3557_v2 }
 0x1a2   : > { %v977_v7 = vsel %vm660_vm0, %v3694_v55, -inf  ;;  %v3724_v43 = vadd.f32 %v3604_v61, %v890_v1  ;;  %v854_v15 = vsub.f32 %v3460_v34, %v3557_v2  ;;  %v897_v34 = vmul.f32 %v3591_v47, %v857_v21 }
 0x1a3   : > { %963 = vmax.xlane.f32.xlu1 %v962_v49  ;;  %960 = vmax.xlane.f32.xlu0 %v959_v57  ;;  %v3701_v49 = vadd.f32 %v3604_v61, %v889_v45  ;;  %v891_v57 = vmul.f32 %v3591_v47, %v851_v50  ;;  %v983_v42 = vsel %vm660_vm0, %v3709_v24, -inf  ;;  %v895_v46 = vmul.f32 %v3591_v47, %v855_v20 }
 0x1a4   : > { %v3741_v50 = vadd.f32 %v3604_v61, %v892_v36  ;;  %v894_v30 = vmul.f32 %v3591_v47, %v854_v15  ;;  %v896_v59 = vmul.f32 %v3591_v47, %v856_v19  ;;  %v3763_v44 = vadd.f32 %v3604_v61, %v897_v34 }
 0x1a5   : > { %v899_v51 = vmul.f32 %v3591_v47, %v859_v25  ;;  %v898_v28 = vmul.f32 %v3591_v47, %v858_v23  ;;  %v901_v5 = vmul.f32 %v3591_v47, %v861_v27  ;;  %v900_v23 = vmul.f32 %v3591_v47, %v860_v26 }
 0x1a6   : > { %v3760_v1 = vadd.f32 %v3604_v61, %v894_v30  ;;  %v3774_v6 = vadd.f32 %v3604_v61, %v896_v59  ;;  %v1010_v62 = vsel %vm660_vm0, %v3763_v44, -inf  ;;  %v903_v36 = vmul.f32 %v3591_v47, %v863_v31 }
 0x1a7   : > { %969 = vmax.xlane.f32.xlu1 %v968_v11  ;;  %966 = vmax.xlane.f32.xlu0 %v965_v13  ;;  %v986_v11 = vsel %vm660_vm0, %v3701_v49, -inf  ;;  %v3719_v13 = vadd.f32 %v3604_v61, %v891_v57  ;;  %v3783_v25 = vadd.f32 %v3604_v61, %v899_v51  ;;  %v3807_v27 = vadd.f32 %v3604_v61, %v901_v5 }
 0x1a8   : > { %v1001_v21 = vsel %vm660_vm0, %v3760_v1, -inf  ;;  %v3810_v22 = vadd.f32 %v3604_v61, %v900_v23  ;;  %v902_v26 = vmul.f32 %v3591_v47, %v862_v29  ;;  %v905_v33 = vmul.f32 %v3591_v47, %v865_v35 }
 0x1a9   : > { %v992_v45 = vsel %vm660_vm0, %v3719_v13, -inf  ;;  %v904_v31 = vmul.f32 %v3591_v47, %v864_v32  ;;  %v1022_v20 = vsel %vm660_vm0, %v3807_v27, -inf  ;;  %v3829_v29 = vadd.f32 %v3604_v61, %v903_v36 }
 0x1aa   : > { %v1019_v39 = vsel %vm660_vm0, %v3810_v22, -inf  ;;  %v3832_v15 = vadd.f32 %v3604_v61, %v902_v26  ;;  %v906_v54 = vmul.f32 %v3591_v47, %v866_v9  ;;  %v907_v60 = vmul.f32 %v3591_v47, %v867_v37 }
 0x1ab   : > { %975 = vmax.xlane.f32.xlu1 %v974_v52  ;;  %972 = vmax.xlane.f32.xlu0 %v971_v56  ;;  %v989_v52 = vsel %vm660_vm0, %v3724_v43, -inf  ;;  %v3738_v56 = vadd.f32 %v3604_v61, %v893_v40  ;;  %v1016_v40 = vsel %vm660_vm0, %v3783_v25, -inf  ;;  %v1028_v32 = vsel %vm660_vm0, %v3829_v29, -inf }
 0x1ac   : > { %v1025_v35 = vsel %vm660_vm0, %v3832_v15, -inf  ;;  %v3857_v2 = vadd.f32 %v3604_v61, %v907_v60  ;;  %v3860_v9 = vadd.f32 %v3604_v61, %v906_v54 }
 0x1ad   : > { %v998_v57 = vsel %vm660_vm0, %v3738_v56, -inf }
 0x1ae   : > { %v1040_v37 = vsel %vm660_vm0, %v3857_v2, -inf  ;;  %v1037_v47 = vsel %vm660_vm0, %v3860_v9, -inf }
 0x1af   : > { %981 = vmax.xlane.f32.xlu1 %v980_v53  ;;  %978 = vmax.xlane.f32.xlu0 %v977_v7  ;;  %v995_v53 = vsel %vm660_vm0, %v3741_v50, -inf  ;;  %v3757_v7 = vadd.f32 %v3604_v61, %v895_v46  ;;  %v3850_v46 = vadd.f32 %v3604_v61, %v904_v31 }
 0x1b1   : > { %v1004_v19 = vsel %vm660_vm0, %v3757_v7, -inf  ;;  %v1031_v10 = vsel %vm660_vm0, %v3850_v46, -inf }
 0x1b3   : > { %987 = vmax.xlane.f32.xlu1 %v986_v11  ;;  %984 = vmax.xlane.f32.xlu0 %v983_v42  ;;  %v1007_v11 = vsel %vm660_vm0, %v3774_v6, -inf  ;;  %v3788_v42 = vadd.f32 %v3604_v61, %v898_v28 }
 0x1b5   : > { %v1013_v17 = vsel %vm660_vm0, %v3788_v42, -inf }
 0x1b7   : > { %993 = vmax.xlane.f32.xlu1 %v992_v45  ;;  %990 = vmax.xlane.f32.xlu0 %v989_v52  ;;  %v3847_v45 = vadd.f32 %v3604_v61, %v905_v33 }
 0x1b9   : > { %v1034_v18 = vsel %vm660_vm0, %v3847_v45, -inf }
 0x1bb   : > { %999 = vmax.xlane.f32.xlu1 %v998_v57  ;;  %996 = vmax.xlane.f32.xlu0 %v995_v53 }
 0x1bf   : > { %1005 = vmax.xlane.f32.xlu1 %v1004_v19  ;;  %1002 = vmax.xlane.f32.xlu0 %v1001_v21 }
 0x1c3   : > { %1011 = vmax.xlane.f32.xlu1 %v1010_v62  ;;  %1008 = vmax.xlane.f32.xlu0 %v1007_v11 }
 0x1c7   : > { %1017 = vmax.xlane.f32.xlu1 %v1016_v40  ;;  %1014 = vmax.xlane.f32.xlu0 %v1013_v17 }
 0x1cb   : > { %1023 = vmax.xlane.f32.xlu1 %v1022_v20  ;;  %1020 = vmax.xlane.f32.xlu0 %v1019_v39 }
 0x1cf   : > { %1029 = vmax.xlane.f32.xlu1 %v1028_v32  ;;  %1026 = vmax.xlane.f32.xlu0 %v1025_v35 }
 0x1d3   : > { %1035 = vmax.xlane.f32.xlu1 %v1034_v18  ;;  %1032 = vmax.xlane.f32.xlu0 %v1031_v10 }
 0x1d7   : > { %1041 = vmax.xlane.f32.xlu1 %v1040_v37  ;;  %1038 = vmax.xlane.f32.xlu0 %v1037_v47 }
 0x224   : > { %v955_v52 = vpop.xlane.xlu1 %954  ;;  %v949_v30 = vpop.xlane.xlu0 %948 }
 0x225   : > { %v1045_v34 = vsub.f32 %v3615_v48, %v955_v52  ;;  %v1043_v59 = vsub.f32 %v3618_v8, %v949_v30 }
 0x227   : > { %v1075_v57 = vmul.f32 1.442695, %v1043_v59  ;;  %v1079_v53 = vmul.f32 1.442695, %v1045_v34 }
 0x228   : > { %v958_v61 = vpop.xlane.xlu1 %957  ;;  %v952_v51 = vpop.xlane.xlu0 %951 }
 0x229   : > { %v1046_v19 = vsub.f32 %v3627_v0, %v958_v61  ;;  %v1044_v21 = vsub.f32 %v3630_v38, %v952_v51  ;;  %2792 = vpow2.f32 %v1075_v57 }
 0x22a   : > { %2794 = vpow2.f32 %v1079_v53 }
 0x22b   : > { %v1077_v28 = vmul.f32 1.442695, %v1044_v21  ;;  %v1081_v62 = vmul.f32 1.442695, %v1046_v19 }
 0x22c   : > { %v964_v11 = vpop.xlane.xlu1 %963  ;;  %v961_v5 = vpop.xlane.xlu0 %960 }
 0x22d   : > { %v1048_v23 = vsub.f32 %v3643_v58, %v964_v11  ;;  %v1047_v48 = vsub.f32 %v3646_v16, %v961_v5  ;;  %2796 = vpow2.f32 %v1077_v28 }
 0x22e   : > { %2798 = vpow2.f32 %v1081_v62 }
 0x22f   : > { %v1083_v8 = vmul.f32 1.442695, %v1047_v48  ;;  %v1085_v40 = vmul.f32 1.442695, %v1048_v23 }
 0x230   : > { %v970_v36 = vpop.xlane.xlu1 %969  ;;  %v967_v17 = vpop.xlane.xlu0 %966 }
 0x231   : > { %v1050_v0 = vsub.f32 %v3653_v63, %v970_v36  ;;  %v1049_v38 = vsub.f32 %v3656_v3, %v967_v17  ;;  %2800 = vpow2.f32 %v1083_v8 }
 0x232   : > { %2802 = vpow2.f32 %v1085_v40 }
 0x233   : > { %v1087_v26 = vmul.f32 1.442695, %v1049_v38  ;;  %v1089_v33 = vmul.f32 1.442695, %v1050_v0 }
 0x234   : > { %v976_v31 = vpop.xlane.xlu1 %975  ;;  %v973_v20 = vpop.xlane.xlu0 %972 }
 0x235   : > { %v1052_v58 = vsub.f32 %v3673_v14, %v976_v31  ;;  %v1051_v16 = vsub.f32 %v3676_v4, %v973_v20  ;;  %2804 = vpow2.f32 %v1087_v26 }
 0x236   : > { %v3876_v39 = vpop.eup %2792  ;;  %2806 = vpow2.f32 %v1089_v33 }
 0x237   : > { %v1091_v54 = vmul.f32 1.442695, %v1051_v16  ;;  %v1093_v60 = vmul.f32 1.442695, %v1052_v58  ;;  %v1139_v63 = vsel %vm660_vm0, %v3876_v39, 0.0  ;;  %v3880_v35 = vpop.eup %2794 }
 0x238   : > { %v982_v32 = vpop.xlane.xlu1 %981  ;;  %v979_v3 = vpop.xlane.xlu0 %978  ;;  %1140 = vadd.xlane.f32.xlu0 %v1139_v63  ;;  %v1145_v52 = vsel %vm660_vm0, %v3880_v35, 0.0 }
 0x239   : > { %v1054_v18 = vsub.f32 %v3691_v12, %v982_v32  ;;  %v1053_v14 = vsub.f32 %v3694_v55, %v979_v3  ;;  %2808 = vpow2.f32 %v1091_v54 }
 0x23a   : > { %v3884_v4 = vpop.eup %2796  ;;  %2810 = vpow2.f32 %v1093_v60 }
 0x23b   : > { %v1095_v10 = vmul.f32 1.442695, %v1053_v14  ;;  %v1097_v37 = vmul.f32 1.442695, %v1054_v18  ;;  %v1142_v30 = vsel %vm660_vm0, %v3884_v4, 0.0  ;;  %v3890_v59 = vpop.eup %2798 }
 0x23c   : > { %v988_v47 = vpop.xlane.xlu1 %987  ;;  %v985_v34 = vpop.xlane.xlu0 %984  ;;  %1146 = vadd.xlane.f32.xlu0 %v1145_v52  ;;  %1143 = vadd.xlane.f32.xlu1 %v1142_v30  ;;  %v1148_v19 = vsel %vm660_vm0, %v3890_v59, 0.0 }
 0x23d   : > { %v1056_v12 = vsub.f32 %v3701_v49, %v988_v47  ;;  %v1055_v55 = vsub.f32 %v3709_v24, %v985_v34  ;;  %2812 = vpow2.f32 %v1095_v10 }
 0x23e   : > { %v3894_v57 = vpop.eup %2800  ;;  %2814 = vpow2.f32 %v1097_v37 }
 0x23f   : > { %v1099_v53 = vmul.f32 1.442695, %v1055_v55  ;;  %v1101_v61 = vmul.f32 1.442695, %v1056_v12  ;;  %v1151_v21 = vsel %vm660_vm0, %v3894_v57, 0.0  ;;  %v3900_v62 = vpop.eup %2802 }
 0x240   : > { %v994_v51 = vpop.xlane.xlu1 %993  ;;  %v991_v28 = vpop.xlane.xlu0 %990  ;;  %1149 = vadd.xlane.f32.xlu1 %v1148_v19  ;;  %1152 = vadd.xlane.f32.xlu0 %v1151_v21  ;;  %v1154_v8 = vsel %vm660_vm0, %v3900_v62, 0.0 }
 0x241   : > { %v1058_v49 = vsub.f32 %v3719_v13, %v994_v51  ;;  %v1057_v24 = vsub.f32 %v3724_v43, %v991_v28  ;;  %2816 = vpow2.f32 %v1099_v53 }
 0x242   : > { %v3904_v11 = vpop.eup %2804  ;;  %2818 = vpow2.f32 %v1101_v61 }
 0x243   : > { %v1103_v5 = vmul.f32 1.442695, %v1057_v24  ;;  %v1105_v23 = vmul.f32 1.442695, %v1058_v49  ;;  %v1157_v40 = vsel %vm660_vm0, %v3904_v11, 0.0  ;;  %v3910_v17 = vpop.eup %2806 }
 0x244   : > { %v1000_v48 = vpop.xlane.xlu1 %999  ;;  %v997_v36 = vpop.xlane.xlu0 %996  ;;  %1155 = vadd.xlane.f32.xlu1 %v1154_v8  ;;  %1158 = vadd.xlane.f32.xlu0 %v1157_v40  ;;  %v1160_v31 = vsel %vm660_vm0, %v3910_v17, 0.0 }
 0x245   : > { %v1060_v13 = vsub.f32 %v3738_v56, %v1000_v48  ;;  %v1059_v43 = vsub.f32 %v3741_v50, %v997_v36  ;;  %2820 = vpow2.f32 %v1103_v5 }
 0x246   : > { %v3914_v0 = vpop.eup %2808  ;;  %2822 = vpow2.f32 %v1105_v23 }
 0x247   : > { %v1107_v38 = vmul.f32 1.442695, %v1059_v43  ;;  %v1109_v26 = vmul.f32 1.442695, %v1060_v13  ;;  %v1163_v20 = vsel %vm660_vm0, %v3914_v0, 0.0  ;;  %v3920_v16 = vpop.eup %2810 }
 0x248   : > { %v1006_v33 = vpop.xlane.xlu1 %1005  ;;  %v1003_v58 = vpop.xlane.xlu0 %1002  ;;  %1161 = vadd.xlane.f32.xlu1 %v1160_v31  ;;  %1164 = vadd.xlane.f32.xlu0 %v1163_v20  ;;  %v1166_v3 = vsel %vm660_vm0, %v3920_v16, 0.0 }
 0x249   : > { %v1062_v56 = vsub.f32 %v3757_v7, %v1006_v33  ;;  %v1061_v50 = vsub.f32 %v3760_v1, %v1003_v58  ;;  %2824 = vpow2.f32 %v1107_v38 }
 0x24a   : > { %v3924_v54 = vpop.eup %2812  ;;  %2826 = vpow2.f32 %v1109_v26 }
 0x24b   : > { %v1111_v60 = vmul.f32 1.442695, %v1061_v50  ;;  %v1113_v32 = vmul.f32 1.442695, %v1062_v56  ;;  %v1169_v18 = vsel %vm660_vm0, %v3924_v54, 0.0  ;;  %v3930_v10 = vpop.eup %2814 }
 0x24c   : > { %v1012_v63 = vpop.xlane.xlu1 %1011  ;;  %v1009_v14 = vpop.xlane.xlu0 %1008  ;;  %1167 = vadd.xlane.f32.xlu1 %v1166_v3  ;;  %1170 = vadd.xlane.f32.xlu0 %v1169_v18  ;;  %v1172_v34 = vsel %vm660_vm0, %v3930_v10, 0.0 }
 0x24d   : > { %v1064_v7 = vsub.f32 %v3763_v44, %v1012_v63  ;;  %v1063_v1 = vsub.f32 %v3774_v6, %v1009_v14  ;;  %2828 = vpow2.f32 %v1111_v60 }
 0x24e   : > { %v3934_v37 = vpop.eup %2816  ;;  %2830 = vpow2.f32 %v1113_v32 }
 0x24f   : > { %v1115_v47 = vmul.f32 1.442695, %v1063_v1  ;;  %v1117_v52 = vmul.f32 1.442695, %v1064_v7  ;;  %v1175_v12 = vsel %vm660_vm0, %v3934_v37, 0.0  ;;  %v3940_v53 = vpop.eup %2818 }
 0x250   : > { %v1018_v30 = vpop.xlane.xlu1 %1017  ;;  %v1015_v55 = vpop.xlane.xlu0 %1014  ;;  %1173 = vadd.xlane.f32.xlu1 %v1172_v34  ;;  %1176 = vadd.xlane.f32.xlu0 %v1175_v12  ;;  %v1178_v28 = vsel %vm660_vm0, %v3940_v53, 0.0 }
 0x251   : > { %v1066_v44 = vsub.f32 %v3783_v25, %v1018_v30  ;;  %v1065_v6 = vsub.f32 %v3788_v42, %v1015_v55  ;;  %2832 = vpow2.f32 %v1115_v47 }
 0x252   : > { %v3944_v61 = vpop.eup %2820  ;;  %2834 = vpow2.f32 %v1117_v52 }
 0x253   : > { %v1119_v51 = vmul.f32 1.442695, %v1065_v6  ;;  %v1121_v19 = vmul.f32 1.442695, %v1066_v44  ;;  %v1181_v49 = vsel %vm660_vm0, %v3944_v61, 0.0  ;;  %v3950_v5 = vpop.eup %2822 }
 0x254   : > { %v1024_v21 = vpop.xlane.xlu1 %1023  ;;  %v1021_v24 = vpop.xlane.xlu0 %1020  ;;  %1179 = vadd.xlane.f32.xlu1 %v1178_v28  ;;  %1182 = vadd.xlane.f32.xlu0 %v1181_v49  ;;  %v1184_v36 = vsel %vm660_vm0, %v3950_v5, 0.0 }
 0x255   : > { %v1068_v25 = vsub.f32 %v3807_v27, %v1024_v21  ;;  %v1067_v42 = vsub.f32 %v3810_v22, %v1021_v24  ;;  %2836 = vpow2.f32 %v1119_v51 }
 0x256   : > { %v3954_v23 = vpop.eup %2824  ;;  %2838 = vpow2.f32 %v1121_v19 }
 0x257   : > { %v1123_v48 = vmul.f32 1.442695, %v1067_v42  ;;  %v1125_v8 = vmul.f32 1.442695, %v1068_v25  ;;  %v1187_v13 = vsel %vm660_vm0, %v3954_v23, 0.0  ;;  %v3960_v38 = vpop.eup %2826 }
 0x258   : > { %v1030_v40 = vpop.xlane.xlu1 %1029  ;;  %v1027_v43 = vpop.xlane.xlu0 %1026  ;;  %1185 = vadd.xlane.f32.xlu1 %v1184_v36  ;;  %1188 = vadd.xlane.f32.xlu0 %v1187_v13  ;;  %v1190_v58 = vsel %vm660_vm0, %v3960_v38, 0.0 }
 0x259   : > { %v1070_v27 = vsub.f32 %v3829_v29, %v1030_v40  ;;  %v1069_v22 = vsub.f32 %v3832_v15, %v1027_v43  ;;  %2840 = vpow2.f32 %v1123_v48 }
 0x25a   : > { %v3964_v26 = vpop.eup %2828  ;;  %2842 = vpow2.f32 %v1125_v8 }
 0x25b   : > { %v1127_v33 = vmul.f32 1.442695, %v1069_v22  ;;  %v1129_v31 = vmul.f32 1.442695, %v1070_v27  ;;  %v1193_v56 = vsel %vm660_vm0, %v3964_v26, 0.0  ;;  %v3970_v60 = vpop.eup %2830  ;;  %v3102_v27 = vmov 0.0  }
 0x25c   : > { %v1036_v20 = vpop.xlane.xlu1 %1035  ;;  %v1033_v50 = vpop.xlane.xlu0 %1032  ;;  %1191 = vadd.xlane.f32.xlu1 %v1190_v58  ;;  %1194 = vadd.xlane.f32.xlu0 %v1193_v56  ;;  %v1196_v14 = vsel %vm660_vm0, %v3970_v60, 0.0  ;;  %1864 = vst [vmem:[#allocation3] sm:$0xf] %v3102_v27  ;;  %v2936_v22 = vld [vmem:[#allocation4 + $0x38] sm:$0xff]  ;;  %v2941_v56 = vld [vmem:[#allocation4 + $0x10] sm:$0xff] }
 0x25d   : > { %v1072_v29 = vsub.f32 %v3847_v45, %v1036_v20  ;;  %v1071_v15 = vsub.f32 %v3850_v46, %v1033_v50  ;;  %2844 = vpow2.f32 %v1127_v33  ;;  %2542 = vmatprep.subr.mxu1 %v3102_v27  ;;  %2558 = vmatprep.mubr.msk.f32.mxu1 %vm3103_vm1, %v3102_v27  ;;  %v2937_v33 = vld [vmem:[#allocation4 + $0x30] sm:$0xff]  ;;  %v2939_v20 = vld [vmem:[#allocation4 + $0x20] sm:$0xff]  ;;  %v2940_v58 = vld [vmem:[#allocation4 + $0x18] sm:$0xff] }
 0x25e   : > { %v3974_v32 = vpop.eup %2832  ;;  %2846 = vpow2.f32 %v1129_v31  ;;  %2543 = vmatpush3.msra.mxu1 %v2936_v22  ;;  %v2938_v31 = vld [vmem:[#allocation4 + $0x28] sm:$0xff] }
 0x25f   : > { %v1131_v63 = vmul.f32 1.442695, %v1071_v15  ;;  %v1133_v3 = vmul.f32 1.442695, %v1072_v29  ;;  %v1199_v7 = vsel %vm660_vm0, %v3974_v32, 0.0  ;;  %v3980_v47 = vpop.eup %2834  ;;  %2544 = vmatprep.subr.mxu1 %v3102_v27  ;;  %v2942_v50 = vld [vmem:[#allocation4 + $0x8] sm:$0xff] }
 0x260   : > { %v1042_v18 = vpop.xlane.xlu1 %1041  ;;  %v1039_v1 = vpop.xlane.xlu0 %1038  ;;  %1197 = vadd.xlane.f32.xlu1 %v1196_v14  ;;  %1200 = vadd.xlane.f32.xlu0 %v1199_v7  ;;  %v1202_v12 = vsel %vm660_vm0, %v3980_v47, 0.0  ;;  %v2943_v29 = vld [vmem:[#allocation4] sm:$0xff] }
 0x261   : > { %v1074_v45 = vsub.f32 %v3857_v2, %v1042_v18  ;;  %v1073_v46 = vsub.f32 %v3860_v9, %v1039_v1  ;;  %2848 = vpow2.f32 %v1131_v63  ;;  %2545 = vmatpush3.msra.mxu1 %v2937_v33 }
 0x262   : > { %v3984_v52 = vpop.eup %2836  ;;  %2850 = vpow2.f32 %v1133_v3  ;;  %2546 = vmatprep.subr.mxu1 %v3102_v27 }
 0x263   : > { %v1135_v30 = vmul.f32 1.442695, %v1073_v46  ;;  %v1137_v34 = vmul.f32 1.442695, %v1074_v45  ;;  %v1205_v55 = vsel %vm660_vm0, %v3984_v52, 0.0  ;;  %v3990_v44 = vpop.eup %2838  ;;  %2547 = vmatpush3.msra.mxu1 %v2938_v31 }
 0x264   : > { %1203 = vadd.xlane.f32.xlu1 %v1202_v12  ;;  %1206 = vadd.xlane.f32.xlu0 %v1205_v55  ;;  %v1208_v9 = vsel %vm660_vm0, %v3990_v44, 0.0 }
 0x265   : > { %2852 = vpow2.f32 %v1135_v30  ;;  %2548 = vmatprep.subr.mxu1 %v3102_v27 }
 0x266   : > { %v3992_v2 = vpop.eup %2840  ;;  %2854 = vpow2.f32 %v1137_v34  ;;  %2549 = vmatpush3.msra.mxu1 %v2939_v20 }
 0x267   : > { %v1211_v6 = vsel %vm660_vm0, %v3992_v2, 0.0  ;;  %v3998_v51 = vpop.eup %2842  ;;  %2550 = vmatprep.subr.mxu1 %v3102_v27 }
 0x268   : > { %1209 = vadd.xlane.f32.xlu1 %v1208_v9  ;;  %1212 = vadd.xlane.f32.xlu0 %v1211_v6  ;;  %v1214_v21 = vsel %vm660_vm0, %v3998_v51, 0.0 }
 0x269   : > { %2551 = vmatpush3.msra.mxu1 %v2940_v58 }
 0x26a   : > { %v4000_v19 = vpop.eup %2844  ;;  %2552 = vmatprep.subr.mxu1 %v3102_v27 }
 0x26b   : > { %v1217_v28 = vsel %vm660_vm0, %v4000_v19, 0.0  ;;  %v4006_v49 = vpop.eup %2846  ;;  %2553 = vmatpush3.msra.mxu1 %v2941_v56 }
 0x26c   : > { %1215 = vadd.xlane.f32.xlu1 %v1214_v21  ;;  %1218 = vadd.xlane.f32.xlu0 %v1217_v28  ;;  %v1220_v25 = vsel %vm660_vm0, %v4006_v49, 0.0 }
 0x26d   : > { %2554 = vmatprep.subr.mxu1 %v3102_v27 }
 0x26e   : > { %v4008_v24 = vpop.eup %2848  ;;  %2555 = vmatpush3.msra.mxu1 %v2942_v50 }
 0x26f   : > { %v1223_v42 = vsel %vm660_vm0, %v4008_v24, 0.0  ;;  %v4014_v48 = vpop.eup %2850  ;;  %2556 = vmatprep.subr.mxu1 %v3102_v27 }
 0x270   : > { %1221 = vadd.xlane.f32.xlu1 %v1220_v25  ;;  %1224 = vadd.xlane.f32.xlu0 %v1223_v42  ;;  %v1226_v40 = vsel %vm660_vm0, %v4014_v48, 0.0 }
 0x271   : > { %2557 = vmatpush3.msra.mxu1 %v2943_v29 }
 0x272   : > { %v4016_v8 = vpop.eup %2852  ;;  %2561 = vmatprep.subr.mxu1 %v3102_v27 }
 0x273   : > { %v1229_v36 = vsel %vm660_vm0, %v4016_v8, 0.0  ;;  %v4022_v13 = vpop.eup %2854 }
 0x274   : > { %1227 = vadd.xlane.f32.xlu1 %v1226_v40  ;;  %1230 = vadd.xlane.f32.xlu0 %v1229_v36  ;;  %v1232_v43 = vsel %vm660_vm0, %v4022_v13, 0.0 }
 0x278   : > { %1233 = vadd.xlane.f32.xlu1 %v1232_v43 }
 0x2c1   : > { %v1141_v15 = vpop.xlane.xlu0 %1140 }
 0x2c2   : > { %2856 = vrcp.f32 %v1141_v15 }
 0x2c5   : > { %v1144_v63 = vpop.xlane.xlu1 %1143  ;;  %v1147_v3 = vpop.xlane.xlu0 %1146 }
 0x2c6   : > { %2858 = vrcp.f32 %v1144_v63 }
 0x2c7   : > { %2860 = vrcp.f32 %v1147_v3 }
 0x2c9   : > { %v1150_v18 = vpop.xlane.xlu1 %1149  ;;  %v1153_v14 = vpop.xlane.xlu0 %1152 }
 0x2ca   : > { %2862 = vrcp.f32 %v1150_v18 }
 0x2cb   : > { %2864 = vrcp.f32 %v1153_v14 }
 0x2cd   : > { %v1156_v7 = vpop.xlane.xlu1 %1155  ;;  %v1159_v1 = vpop.xlane.xlu0 %1158 }
 0x2cf   : > { %v2857_v45 = vpop.eup %2856 }
 0x2d0   : > { %v1267_v46 = vmul.f32 %v2857_v45, %v3876_v39 }
 0x2d1   : > { %v1162_v30 = vpop.xlane.xlu1 %1161  ;;  %v1165_v34 = vpop.xlane.xlu0 %1164 }
 0x2d2   : > { %1299 = vxpose.xlu0.b32.start [1/8] (short) (narrow) %v1267_v46, 8  ;;  %2866 = vrcp.f32 %v1165_v34 }
 0x2d3   : > { %v2859_v12 = vpop.eup %2858  ;;  %2868 = vrcp.f32 %v1156_v7 }
 0x2d4   : > { %v1268_v55 = vmul.f32 %v2859_v12, %v3884_v4  ;;  %v2861_v9 = vpop.eup %2860 }
 0x2d5   : > { %v1168_v6 = vpop.xlane.xlu1 %1167  ;;  %v1171_v21 = vpop.xlane.xlu0 %1170  ;;  %v1269_v28 = vmul.f32 %v2861_v9, %v3880_v35 }
 0x2d6   : > { %2870 = vrcp.f32 %v1168_v6  ;;  %1300 = vxpose.xlu0.b32.cont [2/8] (short) (narrow) %v1268_v55, 8 }
 0x2d7   : > { %2872 = vrcp.f32 %v1159_v1  ;;  %v2863_v25 = vpop.eup %2862 }
 0x2d8   : > { %2874 = vrcp.f32 %v1171_v21  ;;  %v1270_v40 = vmul.f32 %v2863_v25, %v3890_v59  ;;  %v2865_v36 = vpop.eup %2864 }
 0x2d9   : > { %v1174_v42 = vpop.xlane.xlu1 %1173  ;;  %v1177_v39 = vpop.xlane.xlu0 %1176  ;;  %2876 = vrcp.f32 %v1162_v30  ;;  %v1271_v33 = vmul.f32 %v2865_v36, %v3894_v57 }
 0x2da   : > { %1301 = vxpose.xlu0.b32.cont [3/8] (short) (narrow) %v1269_v28, 8  ;;  %2878 = vrcp.f32 %v1174_v42 }
 0x2db   : > { %2880 = vrcp.f32 %v1177_v39 }
 0x2dd   : > { %v1180_v43 = vpop.xlane.xlu1 %1179  ;;  %v1183_v4 = vpop.xlane.xlu0 %1182 }
 0x2de   : > { %1302 = vxpose.xlu0.b32.cont [4/8] (short) (narrow) %v1270_v40, 8 }
 0x2df   : > { %v2867_v22 = vpop.eup %2866 }
 0x2e0   : > { %v2869_v31 = vpop.eup %2868  ;;  %v1275_v58 = vmul.f32 %v2867_v22, %v3914_v0 }
 0x2e1   : > { %v1186_v20 = vpop.xlane.xlu1 %1185  ;;  %v1189_v35 = vpop.xlane.xlu0 %1188  ;;  %v1272_v59 = vmul.f32 %v2869_v31, %v3900_v62 }
 0x2e2   : > { %1303 = vxpose.xlu0.b32.cont [5/8] (short) (narrow) %v1271_v33, 8  ;;  %2882 = vrcp.f32 %v1189_v35  ;;  %1331 = vxpose.xlu1.b32.start [1/8] (short) (narrow) %v1275_v58, 8 }
 0x2e3   : > { %v2871_v56 = vpop.eup %2870  ;;  %2884 = vrcp.f32 %v1180_v43 }
 0x2e4   : > { %v1276_v50 = vmul.f32 %v2871_v56, %v3920_v16  ;;  %v2873_v29 = vpop.eup %2872 }
 0x2e5   : > { %v1192_v15 = vpop.xlane.xlu1 %1191  ;;  %v1195_v63 = vpop.xlane.xlu0 %1194  ;;  %v1273_v57 = vmul.f32 %v2873_v29, %v3904_v11 }
 0x2e6   : > { %v2875_v3 = vpop.eup %2874  ;;  %2886 = vrcp.f32 %v1192_v15  ;;  %1304 = vxpose.xlu0.b32.cont [6/8] (short) (narrow) %v1272_v59, 8  ;;  %1332 = vxpose.xlu1.b32.cont [2/8] (short) (narrow) %v1276_v50, 8 }
 0x2e7   : > { %2888 = vrcp.f32 %v1183_v4  ;;  %v2877_v0 = vpop.eup %2876  ;;  %v1277_v7 = vmul.f32 %v2875_v3, %v3924_v54 }
 0x2e8   : > { %2890 = vrcp.f32 %v1195_v63  ;;  %v2879_v62 = vpop.eup %2878  ;;  %v1274_v16 = vmul.f32 %v2877_v0, %v3910_v17 }
 0x2e9   : > { %v1198_v18 = vpop.xlane.xlu1 %1197  ;;  %v1201_v14 = vpop.xlane.xlu0 %1200  ;;  %2892 = vrcp.f32 %v1186_v20  ;;  %v1278_v46 = vmul.f32 %v2879_v62, %v3930_v10  ;;  %v2951_v62 = vld [vmem:[#allocation4 + $0x40] sm:$0xff] }
 0x2ea   : > { %1305 = vxpose.xlu0.b32.cont [7/8] (short) (narrow) %v1273_v57, 8  ;;  %1333 = vxpose.xlu1.b32.cont [3/8] (short) (narrow) %v1277_v7, 8  ;;  %2894 = vrcp.f32 %v1198_v18  ;;  %v2881_v30 = vpop.eup %2880  ;;  %v2950_v7 = vld [vmem:[#allocation4 + $0x48] sm:$0xff] }
 0x2eb   : > { %2896 = vrcp.f32 %v1201_v14  ;;  %v1279_v54 = vmul.f32 %v2881_v30, %v3934_v37  ;;  %v2949_v14 = vld [vmem:[#allocation4 + $0x50] sm:$0xff]  ;;  %v2955_v30 = vld [vmem:[#allocation4 + $0xa0] sm:$0xff] }
 0x2ed   : > { %v1204_v1 = vpop.xlane.xlu1 %1203  ;;  %v1207_v45 = vpop.xlane.xlu0 %1206 }
 0x2ee   : > { %1306 = vxpose.xlu0.b32.end [8/8] (short) (narrow) %v1274_v16, 8  ;;  %1334 = vxpose.xlu1.b32.cont [4/8] (short) (narrow) %v1278_v46, 8  ;;  %v2954_v46 = vld [vmem:[#allocation4 + $0xa8] sm:$0xff] }
 0x2ef   : > { %v2883_v11 = vpop.eup %2882 }
 0x2f0   : > { %v1283_v55 = vmul.f32 %v2883_v11, %v3954_v23  ;;  %v2885_v9 = vpop.eup %2884  ;;  %v2956_v11 = vld [vmem:[#allocation4 + $0x98] sm:$0xff] }
 0x2f1   : > { %v1210_v34 = vpop.xlane.xlu1 %1209  ;;  %v1213_v12 = vpop.xlane.xlu0 %1212  ;;  %v1280_v28 = vmul.f32 %v2885_v9, %v3940_v53  ;;  %v2960_v9 = vld [vmem:[#allocation4 + $0xf8] sm:$0xff] }
 0x2f2   : > { %2898 = vrcp.f32 %v1213_v12  ;;  %1335 = vxpose.xlu1.b32.cont [5/8] (short) (narrow) %v1279_v54, 8  ;;  %1363 = vxpose.xlu0.b32.start [1/8] (short) (narrow) %v1283_v55, 8  ;;  %v2958_v12 = vld [vmem:[#allocation4 + $0x88] sm:$0xff]  ;;  %v2959_v54 = vld [vmem:[#allocation4 + $0x80] sm:$0xff] }
 0x2f3   : > { %v2887_v6 = vpop.eup %2886  ;;  %2900 = vrcp.f32 %v1204_v1  ;;  %v2952_v1 = vld [vmem:[#allocation4 + $0xb8] sm:$0xff] }
 0x2f4   : > { %v1284_v17 = vmul.f32 %v2887_v6, %v3960_v38  ;;  %v2889_v21 = vpop.eup %2888  ;;  %v2961_v6 = vld [vmem:[#allocation4 + $0xf0] sm:$0xff] }
 0x2f5   : > { %v1216_v10 = vpop.xlane.xlu1 %1215  ;;  %v2891_v25 = vpop.eup %2890  ;;  %v1281_v23 = vmul.f32 %v2889_v21, %v3944_v61  ;;  %v2963_v21 = vld [vmem:[#allocation4 + $0xe0] sm:$0xff] }
 0x2f6   : > { %2902 = vrcp.f32 %v1216_v10  ;;  %v1219_v42 = vpop.xlane.xlu0 %1218  ;;  %1336 = vxpose.xlu1.b32.cont [6/8] (short) (narrow) %v1280_v28, 8  ;;  %1364 = vxpose.xlu0.b32.cont [2/8] (short) (narrow) %v1284_v17, 8  ;;  %v2893_v37 = vpop.eup %2892  ;;  %v1285_v39 = vmul.f32 %v2891_v25, %v3964_v26  ;;  %v2962_v17 = vld [vmem:[#allocation4 + $0xe8] sm:$0xff]  ;;  %v2964_v10 = vld [vmem:[#allocation4 + $0xd8] sm:$0xff]  ;;  %v2965_v28 = vld [vmem:[#allocation4 + $0xd0] sm:$0xff] }
 0x2f7   : > { %2904 = vrcp.f32 %v1207_v45  ;;  %v2895_v40 = vpop.eup %2894  ;;  %v1282_v53 = vmul.f32 %v2893_v37, %v3950_v5  ;;  %v2953_v45 = vld [vmem:[#allocation4 + $0xb0] sm:$0xff]  ;;  %v2966_v25 = vld [vmem:[#allocation4 + $0xc8] sm:$0xff]  ;;  %v2967_v37 = vld [vmem:[#allocation4 + $0xc0] sm:$0xff] }
 0x2f8   : > { %2906 = vrcp.f32 %v1219_v42  ;;  %v1286_v38 = vmul.f32 %v2895_v40, %v3970_v60  ;;  %v2897_v43 = vpop.eup %2896 }
 0x2f9   : > { %v1222_v36 = vpop.xlane.xlu1 %1221  ;;  %2908 = vrcp.f32 %v1210_v34  ;;  %v1287_v61 = vmul.f32 %v2897_v43, %v3974_v32  ;;  %v2957_v34 = vld [vmem:[#allocation4 + $0x90] sm:$0xff] }
 0x2fa   : > { %1337 = vxpose.xlu1.b32.cont [7/8] (short) (narrow) %v1281_v23, 8  ;;  %1365 = vxpose.xlu0.b32.cont [3/8] (short) (narrow) %v1285_v39, 8  ;;  %2910 = vrcp.f32 %v1222_v36  ;;  %v1225_v4 = vpop.xlane.xlu0 %1224 }
 0x2fb   : > { %2912 = vrcp.f32 %v1225_v4 }
 0x2fd   : > { %v1228_v31 = vpop.xlane.xlu1 %1227 }
 0x2fe   : > { %1338 = vxpose.xlu1.b32.end [8/8] (short) (narrow) %v1282_v53, 8  ;;  %1366 = vxpose.xlu0.b32.cont [4/8] (short) (narrow) %v1286_v38, 8  ;;  %2914 = vrcp.f32 %v1228_v31  ;;  %v1231_v56 = vpop.xlane.xlu0 %1230 }
 0x2ff   : > { %v2899_v22 = vpop.eup %2898  ;;  %2916 = vrcp.f32 %v1231_v56 }
 0x300   : > { %v1291_v26 = vmul.f32 %v2899_v22, %v3992_v2  ;;  %v2901_v33 = vpop.eup %2900 }
 0x301   : > { %v1288_v60 = vmul.f32 %v2901_v33, %v3980_v47  ;;  %v1234_v29 = vpop.xlane.xlu1 %1233 }
 0x302   : > { %1367 = vxpose.xlu0.b32.cont [5/8] (short) (narrow) %v1287_v61, 8  ;;  %1395 = vxpose.xlu1.b32.start [1/8] (short) (narrow) %v1291_v26, 8  ;;  %2918 = vrcp.f32 %v1234_v29 }
 0x303   : > { %v2903_v20 = vpop.eup %2902 }
 0x304   : > { %v1292_v35 = vmul.f32 %v2903_v20, %v3998_v51  ;;  %v2905_v5 = vpop.eup %2904 }
 0x305   : > { %v2907_v58 = vpop.eup %2906  ;;  %v1289_v32 = vmul.f32 %v2905_v5, %v3984_v52 }
 0x306   : > { %1368 = vxpose.xlu0.b32.cont [6/8] (short) (narrow) %v1288_v60, 8  ;;  %1396 = vxpose.xlu1.b32.cont [2/8] (short) (narrow) %v1292_v35, 8  ;;  %v2909_v59 = vpop.eup %2908  ;;  %v1293_v2 = vmul.f32 %v2907_v58, %v4000_v19 }
 0x307   : > { %v2911_v50 = vpop.eup %2910  ;;  %v1290_v51 = vmul.f32 %v2909_v59, %v3990_v44 }
 0x308   : > { %v1294_v15 = vmul.f32 %v2911_v50, %v4006_v49  ;;  %v2913_v47 = vpop.eup %2912  ;;  %v2944_v49 = vld [vmem:[#allocation4 + $0x78] sm:$0xff] }
 0x309   : > { %v1295_v63 = vmul.f32 %v2913_v47, %v4008_v24  ;;  %v2945_v24 = vld [vmem:[#allocation4 + $0x70] sm:$0xff] }
 0x30a   : > { %1369 = vxpose.xlu0.b32.cont [7/8] (short) (narrow) %v1289_v32, 8  ;;  %1397 = vxpose.xlu1.b32.cont [3/8] (short) (narrow) %v1293_v2, 8 }
 0x30b   : > { %v2915_v3 = vpop.eup %2914 }
 0x30c   : > { %v1296_v52 = vmul.f32 %v2915_v3, %v4014_v48  ;;  %v2917_v57 = vpop.eup %2916  ;;  %v2946_v48 = vld [vmem:[#allocation4 + $0x68] sm:$0xff] }
 0x30d   : > { %v1297_v19 = vmul.f32 %v2917_v57, %v4016_v8  ;;  %v2947_v8 = vld [vmem:[#allocation4 + $0x60] sm:$0xff] }
 0x30e   : > { %1370 = vxpose.xlu0.b32.end [8/8] (short) (narrow) %v1290_v51, 8  ;;  %1398 = vxpose.xlu1.b32.cont [4/8] (short) (narrow) %v1294_v15, 8 }
 0x30f   : > { %v2919_v0 = vpop.eup %2918 }
 0x310   : > { %v1298_v18 = vmul.f32 %v2919_v0, %v4022_v13  ;;  %v2948_v13 = vld [vmem:[#allocation4 + $0x58] sm:$0xff] }
 0x312   : > { %1399 = vxpose.xlu1.b32.cont [5/8] (short) (narrow) %v1295_v63, 8 }
 0x316   : > { %1400 = vxpose.xlu1.b32.cont [6/8] (short) (narrow) %v1296_v52, 8 }
 0x31a   : > { %1401 = vxpose.xlu1.b32.cont [7/8] (short) (narrow) %v1297_v19, 8 }
 0x31e   : > { %1402 = vxpose.xlu1.b32.end [8/8] (short) (narrow) %v1298_v18, 8 }
 0x34e   : > { %v1315_v44 = vpop.trf.xlu0 }
 0x34f   : > { %2559 = vmatmul.mubr.msk.f32.vlgmr.msra.gmra.mxu1 %vm1427_vm2, %v1315_v44 }
 0x350   : > { %2562 = vmatpush3.msra.mxu1 %v2944_v49  ;;  %2577 = vmatprep.mubr.msk.f32.mxu1 %vm3103_vm1, %v3102_v27 }
 0x351   : > { %2563 = vmatprep.subr.mxu1 %v3102_v27 }
 0x352   : > { %2564 = vmatpush3.msra.mxu1 %v2945_v24 }
 0x353   : > { %2565 = vmatprep.subr.mxu1 %v3102_v27 }
 0x354   : > { %2566 = vmatpush3.msra.mxu1 %v2946_v48 }
 0x355   : > { %2567 = vmatprep.subr.mxu1 %v3102_v27 }
 0x356   : > { %2568 = vmatpush3.msra.mxu1 %v2947_v8 }
 0x357   : > { %2569 = vmatprep.subr.mxu1 %v3102_v27 }
 0x358   : > { %2570 = vmatpush3.msra.mxu1 %v2948_v13 }
 0x359   : > { %2571 = vmatprep.subr.mxu1 %v3102_v27 }
 0x35a   : > { %2572 = vmatpush3.msra.mxu1 %v2949_v14 }
 0x35b   : > { %2573 = vmatprep.subr.mxu1 %v3102_v27 }
 0x35c   : > { %2574 = vmatpush3.msra.mxu1 %v2950_v7 }
 0x35d   : > { %2575 = vmatprep.subr.mxu1 %v3102_v27 }
 0x35e   : > { %2576 = vmatpush3.msra.mxu1 %v2951_v62  ;;  %v1347_v16 = vpop.trf.xlu1 }
 0x35f   : > { %2580 = vmatprep.subr.mxu1 %v3102_v27  ;;  %2578 = vmatmul.mubr.msk.f32.vlgmr.msra.gmra.mxu1 %vm1427_vm2, %v1347_v16 }
 0x360   : > { %2581 = vmatpush3.msra.mxu1 %v2952_v1  ;;  %2596 = vmatprep.mubr.msk.f32.mxu1 %vm3103_vm1, %v3102_v27 }
 0x361   : > { %2582 = vmatprep.subr.mxu1 %v3102_v27 }
 0x362   : > { %2583 = vmatpush3.msra.mxu1 %v2953_v45 }
 0x363   : > { %2584 = vmatprep.subr.mxu1 %v3102_v27 }
 0x364   : > { %2585 = vmatpush3.msra.mxu1 %v2954_v46 }
 0x365   : > { %2586 = vmatprep.subr.mxu1 %v3102_v27 }
 0x366   : > { %2587 = vmatpush3.msra.mxu1 %v2955_v30 }
 0x367   : > { %2588 = vmatprep.subr.mxu1 %v3102_v27 }
 0x368   : > { %2589 = vmatpush3.msra.mxu1 %v2956_v11 }
 0x369   : > { %2590 = vmatprep.subr.mxu1 %v3102_v27 }
 0x36a   : > { %2591 = vmatpush3.msra.mxu1 %v2957_v34 }
 0x36b   : > { %2592 = vmatprep.subr.mxu1 %v3102_v27 }
 0x36c   : > { %2593 = vmatpush3.msra.mxu1 %v2958_v12 }
 0x36d   : > { %2594 = vmatprep.subr.mxu1 %v3102_v27 }
 0x36e   : > { %2595 = vmatpush3.msra.mxu1 %v2959_v54  ;;  %v1379_v55 = vpop.trf.xlu0 }
 0x36f   : > { %2597 = vmatmul.mubr.msk.f32.vlgmr.msra.gmra.mxu1 %vm1427_vm2, %v1379_v55  ;;  %2599 = vmatprep.subr.mxu1 %v3102_v27 }
 0x370   : > { %2600 = vmatpush3.msra.mxu1 %v2960_v9  ;;  %2615 = vmatprep.mubr.msk.f32.mxu1 %vm3103_vm1, %v3102_v27 }
 0x371   : > { %2601 = vmatprep.subr.mxu1 %v3102_v27 }
 0x372   : > { %2602 = vmatpush3.msra.mxu1 %v2961_v6 }
 0x373   : > { %2603 = vmatprep.subr.mxu1 %v3102_v27 }
 0x374   : > { %2604 = vmatpush3.msra.mxu1 %v2962_v17 }
 0x375   : > { %2605 = vmatprep.subr.mxu1 %v3102_v27 }
 0x376   : > { %2606 = vmatpush3.msra.mxu1 %v2963_v21 }
 0x377   : > { %2607 = vmatprep.subr.mxu1 %v3102_v27 }
 0x378   : > { %2608 = vmatpush3.msra.mxu1 %v2964_v10 }
 0x379   : > { %2609 = vmatprep.subr.mxu1 %v3102_v27 }
 0x37a   : > { %2610 = vmatpush3.msra.mxu1 %v2965_v28 }
 0x37b   : > { %2611 = vmatprep.subr.mxu1 %v3102_v27 }
 0x37c   : > { %2612 = vmatpush3.msra.mxu1 %v2966_v25 }
 0x37d   : > { %2613 = vmatprep.subr.mxu1 %v3102_v27 }
 0x37e   : > { %v1411_v42 = vpop.trf.xlu1  ;;  %2614 = vmatpush3.msra.mxu1 %v2967_v37 }
 0x37f   : > { %2616 = vmatmul.mubr.msk.f32.vlgmr.msra.gmra.mxu1 %vm1427_vm2, %v1411_v42 }
 0x40f   : > { %v4103_v23 = vpop.f32.mrf.mxu1 }
 0x410   : > { %v1720_v39 = vmul.f32 %v4103_v23, %v4103_v23 }
 0x411   : > { %v2560_v40 = vpop.f32.mrf.mxu1 }
 0x412   : > { %1724 = vadd.xlane.f32.xlu0 %v1720_v39  ;;  %v3104_v39 = vmov 1983009808  }
 0x413   : > { %v1791_v40 = vunpack.c.l.s4 %v3104_v39 }
 0x41f   : > { %v4107_v36 = vpop.f32.mrf.mxu1 }
 0x420   : > { %v1721_v53 = vmul.f32 %v4107_v36, %v4107_v36 }
 0x421   : > { %v2579_v38 = vpop.f32.mrf.mxu1 }
 0x422   : > { %1726 = vadd.xlane.f32.xlu1 %v1721_v53 }
 0x42f   : > { %v4111_v43 = vpop.f32.mrf.mxu1 }
 0x430   : > { %v1722_v4 = vmul.f32 %v4111_v43, %v4111_v43 }
 0x431   : > { %v2598_v22 = vpop.f32.mrf.mxu1 }
 0x432   : > { %1728 = vadd.xlane.f32.xlu0 %v1722_v4  ;;  %v1792_v22 = vunpack.c.0.s8 %v1791_v40 }
 0x43f   : > { %v4115_v61 = vpop.f32.mrf.mxu1 }
 0x440   : > { %v1723_v26 = vmul.f32 %v4115_v61, %v4115_v61 }
 0x441   : > { %v2617_v33 = vpop.f32.mrf.mxu1 }
 0x442   : > { %1730 = vadd.xlane.f32.xlu1 %v1723_v26  ;;  %v3105_v26 = vmov 1934713408  }
 0x443   : > { %v1823_v33 = vunpack.c.l.s4 %v3105_v26 }
 0x49b   : > { %v1725_v31 = vpop.xlane.xlu0 %1724 }
 0x49c   : > { %v1732_v35 = vmax.f32 %v1725_v31, 1e-24 }
 0x49e   : > { %2920 = vrsqrt.f32 %v1732_v35 }
 0x4ab   : > { %v1727_v20 = vpop.xlane.xlu1 %1726  ;;  %v2921_v56 = vpop.eup %2920 }
 0x4ac   : > { %v1733_v5 = vmax.f32 %v1727_v20, 1e-24  ;;  %v1740_v32 = vmul.f32 %v2921_v56, %v2921_v56 }
 0x4ae   : > { %2922 = vrsqrt.f32 %v1733_v5  ;;  %v1744_v50 = vmul.f32 %v1740_v32, %v1725_v31  ;;  %v1824_v32 = vunpack.c.0.s8 %v1823_v33 }
 0x4b0   : > { %v1748_v3 = vrot.slane %v1744_v50, 4 }
 0x4b2   : > { %v1749_v0 = vadd.f32 %v1748_v3, %v1744_v50 }
 0x4b4   : > { %v1750_v24 = vrot.slane %v1749_v0, 2 }
 0x4b6   : > { %v1751_v13 = vadd.f32 %v1750_v24, %v1749_v0 }
 0x4b8   : > { %v1752_v16 = vrot.slane %v1751_v13, 1 }
 0x4ba   : > { %v1753_v11 = vadd.f32 %v1752_v16, %v1751_v13 }
 0x4bb   : > { %v1729_v60 = vpop.xlane.xlu0 %1728  ;;  %v2923_v59 = vpop.eup %2922 }
 0x4bc   : > { %v1734_v58 = vmax.f32 %v1729_v60, 1e-24  ;;  %v1741_v2 = vmul.f32 %v2923_v59, %v2923_v59  ;;  %v1772_v9 = vmax.f32 %v1753_v11, 1e-24 }
 0x4be   : > { %2924 = vrsqrt.f32 %v1734_v58  ;;  %v1745_v51 = vmul.f32 %v1741_v2, %v1727_v20  ;;  %v1795_v58 = vsub.s32 %v1792_v22, %v3585_v41 }
 0x4c0   : > { %v1754_v57 = vrot.slane %v1745_v51, 4 }
 0x4c2   : > { %v1755_v44 = vadd.f32 %v1754_v57, %v1745_v51 }
 0x4c4   : > { %v1756_v48 = vrot.slane %v1755_v44, 2 }
 0x4c6   : > { %v1757_v14 = vadd.f32 %v1756_v48, %v1755_v44 }
 0x4c8   : > { %v1758_v45 = vrot.slane %v1757_v14, 1 }
 0x4ca   : > { %v1759_v12 = vadd.f32 %v1758_v45, %v1757_v14 }
 0x4cb   : > { %v2925_v29 = vpop.eup %2924  ;;  %v1731_v15 = vpop.xlane.xlu1 %1730 }
 0x4cc   : > { %v1742_v47 = vmul.f32 %v2925_v29, %v2925_v29  ;;  %v1735_v63 = vmax.f32 %v1731_v15, 1e-24  ;;  %v1773_v17 = vmax.f32 %v1759_v12, 1e-24 }
 0x4ce   : > { %v1746_v52 = vmul.f32 %v1742_v47, %v1729_v60  ;;  %2926 = vrsqrt.f32 %v1735_v63  ;;  %v1827_v47 = vsub.s32 %v1824_v32, %v3585_v41 }
 0x4d0   : > { %v1760_v19 = vrot.slane %v1746_v52, 4 }
 0x4d2   : > { %v1761_v18 = vadd.f32 %v1760_v19, %v1746_v52 }
 0x4d4   : > { %v1762_v49 = vrot.slane %v1761_v18, 2 }
 0x4d6   : > { %v1763_v8 = vadd.f32 %v1762_v49, %v1761_v18 }
 0x4d8   : > { %v1764_v7 = vrot.slane %v1763_v8, 1 }
 0x4da   : > { %v1765_v46 = vadd.f32 %v1764_v7, %v1763_v8 }
 0x4db   : > { %v2927_v62 = vpop.eup %2926 }
 0x4dc   : > { %v1743_v1 = vmul.f32 %v2927_v62, %v2927_v62  ;;  %v1774_v54 = vmax.f32 %v1765_v46, 1e-24 }
 0x4de   : > { %v1747_v30 = vmul.f32 %v1743_v1, %v1731_v15  ;;  %2928 = vrsqrt.f32 %v1774_v54 }
 0x4df   : > { %2930 = vrsqrt.f32 %v1772_v9 }
 0x4e0   : > { %v1766_v34 = vrot.slane %v1747_v30, 4  ;;  %2932 = vrsqrt.f32 %v1773_v17 }
 0x4e2   : > { %v1767_v55 = vadd.f32 %v1766_v34, %v1747_v30 }
 0x4e4   : > { %v1768_v6 = vrot.slane %v1767_v55, 2 }
 0x4e6   : > { %v1769_v21 = vadd.f32 %v1768_v6, %v1767_v55 }
 0x4e8   : > { %v1770_v10 = vrot.slane %v1769_v21, 1 }
 0x4ea   : > { %v1771_v28 = vadd.f32 %v1770_v10, %v1769_v21 }
 0x4eb   : > { %v2929_v42 = vpop.eup %2928 }
 0x4ec   : > { %v1775_v25 = vmax.f32 %v1771_v28, 1e-24  ;;  %v2931_v37 = vpop.eup %2930  ;;  %v1782_v53 = vmul.f32 %v2929_v42, %v2925_v29 }
 0x4ed   : > { %v2933_v38 = vpop.eup %2932  ;;  %v1780_v4 = vmul.f32 %v2931_v37, %v2921_v56 }
 0x4ee   : > { %2934 = vrsqrt.f32 %v1775_v25  ;;  %v1781_v31 = vmul.f32 %v2933_v38, %v2923_v59  ;;  %v1786_v20 = vmul.f32 %v1782_v53, %v4111_v43 }
 0x4ef   : > { %v1784_v5 = vmul.f32 %v1780_v4, %v4103_v23 }
 0x4f0   : > { %v1785_v2 = vmul.f32 %v1781_v31, %v4107_v36 }
 0x4f1   : > { %v1788_v50 = vcombine.low %v1784_v5, %v1786_v20  ;;  %v1789_v51 = vcombine.high %v1784_v5, %v1786_v20 }
 0x4f3   : > { %v1796_v59 = vrot.slane %v1788_v50, %v1795_v58  ;;  %v1803_v63 = vrot.slane %v1789_v51, %v1795_v58 }
 0x4fb   : > { %v2935_v35 = vpop.eup %2934 }
 0x4fc   : > { %v1783_v60 = vmul.f32 %v2935_v35, %v2927_v62 }
 0x4fe   : > { %v1787_v29 = vmul.f32 %v1783_v60, %v4115_v61 }
 0x500   : > { %v1804_v56 = vcombine.low %v1785_v2, %v1787_v29  ;;  %v1805_v15 = vcombine.high %v1785_v2, %v1787_v29 }
 0x502   : > { %v1812_v43 = vrot.slane %v1804_v56, %v1795_v58  ;;  %v1819_v3 = vrot.slane %v1805_v15, %v1795_v58 }
 0x504   : > { %v1820_v52 = vcombine.low %v1796_v59, %v1812_v43  ;;  %v1821_v23 = vcombine.high %v1796_v59, %v1812_v43  ;;  %v1836_v57 = vcombine.low %v1803_v63, %v1819_v3  ;;  %v1837_v19 = vcombine.high %v1803_v63, %v1819_v3 }
 0x506   : > { %v1828_v0 = vrot.slane %v1820_v52, %v1827_v47  ;;  %v1835_v18 = vrot.slane %v1821_v23, %v1827_v47  ;;  %v1844_v44 = vrot.slane %v1836_v57, %v1827_v47  ;;  %v1851_v36 = vrot.slane %v1837_v19, %v1827_v47  ;;  %2310 = vst.sshfl [vmem:[#allocation2] sm:$0x55 pattern:$0x73516240] %v1820_v52 }
 0x507   : > { %2311 = vst.sshfl [vmem:[#allocation2 + $0x8] sm:$0x55 pattern:$0x73516240] %v1821_v23 }
 0x508   : > { %2312 = vst.sshfl [vmem:[#allocation2 + $0x10] sm:$0x55 pattern:$0x73516240] %v1836_v57  ;;  %v1852_v61 = vcombine.high %v1828_v0, %v3102_v27  ;;  %v1853_v41 = vcombine.high %v1835_v18, %v3102_v27  ;;  %v1854_v49 = vcombine.high %v1844_v44, %v3102_v27  ;;  %v1855_v24 = vcombine.high %v1851_v36, %v3102_v27 }
 0x509   : > { %2313 = vst.sshfl [vmem:[#allocation2 + $0x18] sm:$0x55 pattern:$0x73516240] %v1837_v19 }
 0x50a   : > { %1857 = vst [vmem:[#allocation2 + $0x4] sm:$0xf] %v1852_v61  ;;  %1859 = vst [vmem:[#allocation2 + $0xc] sm:$0xf] %v1853_v41 }
 0x50b   : > { %1861 = vst [vmem:[#allocation2 + $0x14] sm:$0xf] %v1854_v49  ;;  %1863 = vst [vmem:[#allocation2 + $0x1c] sm:$0xf] %v1855_v24 }
 0x50c PF: > { %v1885_v48 = vld [vmem:[%s3277_s13 + $0x78] sm:$0xff]  ;;  %v3106_v13 = vmov 0.0   ;;  %v1884_v27 = vld [vmem:[%s3277_s13 + $0x70] sm:$0xff]  ;;  %v1883_v7 = vld [vmem:[%s3277_s13 + $0x68] sm:$0xff]  ;;  %s2326_s18 = sshll.u32 %s3185_s17, 3  ;;  %vm3107_vm3 = vmmov 0  }
 0x50d   : > { %v1901_v8 = vld [vmem:[%s3277_s13 + $0xf8] sm:$0xff]  ;;  %2618 = vmatprep.subr.mxu0 %v3106_v13  ;;  %2653 = vmatprep.subr.mxu1 %v3106_v13  ;;  %v1900_v14 = vld [vmem:[%s3277_s13 + $0xf0] sm:$0xff]  ;;  %v1899_v62 = vld [vmem:[%s3277_s13 + $0xe8] sm:$0xff]  ;;  %s1867_s26 = scalar_lea.vmem [#allocation2], %s2326_s18  ;;  %p2316_p6 = scmp.ne.s32.totalorder %s3185_s17, 3 }
 0x50e   : > { %2619 = vmatpush3.msra.mxu0 %v1885_v48  ;;  %2654 = vmatpush3.msra.mxu1 %v1901_v8  ;;  %v1882_v16 = vld [vmem:[%s3277_s13 + $0x60] sm:$0xff]  ;;  %v1881_v45 = vld [vmem:[%s3277_s13 + $0x58] sm:$0xff]  ;;  %v1880_v30 = vld [vmem:[%s3277_s13 + $0x50] sm:$0xff] }
 0x50f   : > { %2620 = vmatprep.subr.mxu0 %v3106_v13  ;;  %2655 = vmatprep.subr.mxu1 %v3106_v13  ;;  %v1898_v1 = vld [vmem:[%s3277_s13 + $0xe0] sm:$0xff]  ;;  %v1897_v46 = vld [vmem:[%s3277_s13 + $0xd8] sm:$0xff]  ;;  %v1896_v11 = vld [vmem:[%s3277_s13 + $0xd0] sm:$0xff] }
 0x510   : > { %2621 = vmatpush3.msra.mxu0 %v1884_v27  ;;  %2656 = vmatpush3.msra.mxu1 %v1900_v14  ;;  %v1879_v34 = vld [vmem:[%s3277_s13 + $0x48] sm:$0xff]  ;;  %v1878_v54 = vld [vmem:[%s3277_s13 + $0x40] sm:$0xff]  ;;  %v1877_v9 = vld [vmem:[%s3277_s13 + $0x38] sm:$0xff] }
 0x511   : > { %2622 = vmatprep.subr.mxu0 %v3106_v13  ;;  %2657 = vmatprep.subr.mxu1 %v3106_v13  ;;  %v1895_v12 = vld [vmem:[%s3277_s13 + $0xc8] sm:$0xff]  ;;  %v1894_v55 = vld [vmem:[%s3277_s13 + $0xc0] sm:$0xff]  ;;  %v1893_v6 = vld [vmem:[%s3277_s13 + $0xb8] sm:$0xff] }
 0x512   : > { %2623 = vmatpush3.msra.mxu0 %v1883_v7  ;;  %2658 = vmatpush3.msra.mxu1 %v1899_v62  ;;  %v1876_v17 = vld [vmem:[%s3277_s13 + $0x30] sm:$0xff]  ;;  %v1875_v10 = vld [vmem:[%s3277_s13 + $0x28] sm:$0xff]  ;;  %v1874_v25 = vld [vmem:[%s3277_s13 + $0x20] sm:$0xff] }
 0x513   : > { %2624 = vmatprep.subr.mxu0 %v3106_v13  ;;  %2659 = vmatprep.subr.mxu1 %v3106_v13  ;;  %v1892_v21 = vld [vmem:[%s3277_s13 + $0xb0] sm:$0xff]  ;;  %v1891_v28 = vld [vmem:[%s3277_s13 + $0xa8] sm:$0xff]  ;;  %v1890_v42 = vld [vmem:[%s3277_s13 + $0xa0] sm:$0xff] }
 0x514   : > { %2625 = vmatpush3.msra.mxu0 %v1882_v16  ;;  %2660 = vmatpush3.msra.mxu1 %v1898_v1  ;;  %v1873_v37 = vld [vmem:[%s3277_s13 + $0x18] sm:$0xff]  ;;  %v1872_v40 = vld [vmem:[%s3277_s13 + $0x10] sm:$0xff]  ;;  %v1871_v38 = vld [vmem:[%s3277_s13 + $0x8] sm:$0xff] }
 0x515   : > { %2626 = vmatprep.subr.mxu0 %v3106_v13  ;;  %2661 = vmatprep.subr.mxu1 %v3106_v13  ;;  %v1889_v39 = vld [vmem:[%s3277_s13 + $0x98] sm:$0xff]  ;;  %v1888_v53 = vld [vmem:[%s3277_s13 + $0x90] sm:$0xff]  ;;  %v1887_v4 = vld [vmem:[%s3277_s13 + $0x88] sm:$0xff] }
 0x516   : > { %2627 = vmatpush3.msra.mxu0 %v1881_v45  ;;  %2662 = vmatpush3.msra.mxu1 %v1897_v46  ;;  %v1870_v22 = vld [vmem:[%s3277_s13] sm:$0xff]  ;;  %v1868_v33 = vld [vmem:[%s1867_s26] sm:$0xf] }
 0x517   : > { %2628 = vmatprep.subr.mxu0 %v3106_v13  ;;  %2663 = vmatprep.subr.mxu1 %v3106_v13  ;;  %v1886_v26 = vld [vmem:[%s3277_s13 + $0x80] sm:$0xff]  ;;  %v1902_v20 = vld [vmem:[#allocation3] sm:$0xf] }
 0x518   : > { %2629 = vmatpush3.msra.mxu0 %v1880_v30  ;;  %2664 = vmatpush3.msra.mxu1 %v1896_v11  ;;  %v1869_v31 = vld [vmem:[%s1867_s26 + $0x4] sm:$0xf] }
 0x519   : > { %2630 = vmatprep.subr.mxu0 %v3106_v13  ;;  %2665 = vmatprep.subr.mxu1 %v3106_v13 }
 0x51a   : > { %2631 = vmatpush3.msra.mxu0 %v1879_v34  ;;  %2666 = vmatpush3.msra.mxu1 %v1895_v12 }
 0x51b   : > { %2632 = vmatprep.subr.mxu0 %v3106_v13  ;;  %2667 = vmatprep.subr.mxu1 %v3106_v13 }
 0x51c   : > { %2633 = vmatpush3.msra.mxu0 %v1878_v54  ;;  %2668 = vmatpush3.msra.mxu1 %v1894_v55 }
 0x51d   : > { %2634 = vmatprep.subr.mxu0 %v3106_v13  ;;  %2669 = vmatprep.subr.mxu1 %v3106_v13 }
 0x51e   : > { %2635 = vmatpush3.msra.mxu0 %v1877_v9  ;;  %2670 = vmatpush3.msra.mxu1 %v1893_v6 }
 0x51f   : > { %2636 = vmatprep.subr.mxu0 %v3106_v13  ;;  %2671 = vmatprep.subr.mxu1 %v3106_v13 }
 0x520   : > { %2637 = vmatpush3.msra.mxu0 %v1876_v17  ;;  %2672 = vmatpush3.msra.mxu1 %v1892_v21 }
 0x521   : > { %2638 = vmatprep.subr.mxu0 %v3106_v13  ;;  %2673 = vmatprep.subr.mxu1 %v3106_v13 }
 0x522   : > { %2639 = vmatpush3.msra.mxu0 %v1875_v10  ;;  %2674 = vmatpush3.msra.mxu1 %v1891_v28 }
 0x523   : > { %2640 = vmatprep.subr.mxu0 %v3106_v13  ;;  %2675 = vmatprep.subr.mxu1 %v3106_v13 }
 0x524   : > { %2641 = vmatpush3.msra.mxu0 %v1874_v25  ;;  %2676 = vmatpush3.msra.mxu1 %v1890_v42 }
 0x525   : > { %2642 = vmatprep.subr.mxu0 %v3106_v13  ;;  %2677 = vmatprep.subr.mxu1 %v3106_v13 }
 0x526   : > { %2643 = vmatpush3.msra.mxu0 %v1873_v37  ;;  %2678 = vmatpush3.msra.mxu1 %v1889_v39 }
 0x527   : > { %2644 = vmatprep.subr.mxu0 %v3106_v13  ;;  %2679 = vmatprep.subr.mxu1 %v3106_v13 }
 0x528   : > { %2645 = vmatpush3.msra.mxu0 %v1872_v40  ;;  %2680 = vmatpush3.msra.mxu1 %v1888_v53 }
 0x529   : > { %2646 = vmatprep.subr.mxu0 %v3106_v13  ;;  %2681 = vmatprep.subr.mxu1 %v3106_v13 }
 0x52a   : > { %2647 = vmatpush3.msra.mxu0 %v1871_v38  ;;  %2682 = vmatpush3.msra.mxu1 %v1887_v4 }
 0x52b   : > { %2648 = vmatprep.subr.mxu0 %v3106_v13  ;;  %2683 = vmatprep.subr.mxu1 %v3106_v13 }
 0x52c   : > { %2649 = vmatpush3.msra.mxu0 %v1870_v22  ;;  %2650 = vmatprep.mubr.msk.f32.mxu0 %vm3107_vm3, %v3106_v13 }
 0x52d   : > { %2684 = vmatpush3.msra.mxu1 %v1886_v26  ;;  %2685 = vmatprep.mubr.msk.f32.mxu1 %vm3107_vm3, %v3106_v13 }
 0x52e   : > { %2651 = vmatmul.mubr.f32.vlgmr.msra.gmra.mxu0 %v1868_v33  ;;  %2686 = vmatmul.mubr.f32.vlgmr.msra.gmra.mxu1 %v1869_v31 }
 0x5ee   : > { %v1969_v35 = vpop.f32.mrf.mxu0  ;;  %v2040_v5 = vpop.f32.mrf.mxu1 }
 0x5ef   : > { %v1973_v60 = vadd.f32 %v1969_v35, %v1902_v20  ;;  %2049 = sbr.rel (%p2316_p6) target bundleno = 1849 (0x739), region = 76 }
 0x5f0   : > { %v2652_v58 = vpop.f32.mrf.mxu0  ;;  %v2687_v32 = vpop.f32.mrf.mxu1 }
 0x5f1   : > { %v2044_v2 = vadd.f32 %v2040_v5, %v1973_v60 }
 0x5f3   : > { %2045 = vst [vmem:[#allocation3] sm:$0xf] %v2044_v2 }
 0x5f4   : > { %v2105_v50 = vld [vmem:[%s4316_s7 + $0x78] sm:$0xff]  ;;  %v3108_v51 = vmov 0.0   ;;  %v2104_v29 = vld [vmem:[%s4316_s7 + $0x70] sm:$0xff]  ;;  %vm3109_vm4 = vmmov 0   ;;  %v2103_v56 = vld [vmem:[%s4316_s7 + $0x68] sm:$0xff]  ;;  %vm2051_vm5 = vcmask 1043456   ;;  %v2077_v9 = vlaneseq }
 0x5f5   : > { %2688 = vmatprep.subr.mxu0 %v3108_v51  ;;  %2720 = vmatprep.mubr.msk.f32.mxu0 %vm3109_vm4, %v3108_v51  ;;  %v2102_v15 = vld [vmem:[%s4316_s7 + $0x60] sm:$0xff]  ;;  %v2101_v43 = vld [vmem:[%s4316_s7 + $0x58] sm:$0xff]  ;;  %v2100_v23 = vld [vmem:[%s4316_s7 + $0x50] sm:$0xff] }
 0x5f6   : > { %2689 = vmatpush3.msra.mxu0 %v2105_v50  ;;  %v2099_v0 = vld [vmem:[%s4316_s7 + $0x48] sm:$0xff]  ;;  %v2098_v36 = vld [vmem:[%s4316_s7 + $0x40] sm:$0xff]  ;;  %v2097_v49 = vld [vmem:[%s4316_s7 + $0x38] sm:$0xff]  ;;  %v2078_v6 = vshrl.u32 %v2077_v9, 7 }
 0x5f7   : > { %2690 = vmatprep.subr.mxu0 %v3108_v51  ;;  %v2096_v8 = vld [vmem:[%s4316_s7 + $0x30] sm:$0xff]  ;;  %v2095_v14 = vld [vmem:[%s4316_s7 + $0x28] sm:$0xff]  ;;  %v2094_v16 = vld [vmem:[%s4316_s7 + $0x20] sm:$0xff] }
 0x5f8   : > { %2691 = vmatpush3.msra.mxu0 %v2104_v29  ;;  %v2093_v46 = vld [vmem:[%s4316_s7 + $0x18] sm:$0xff]  ;;  %v2092_v11 = vld [vmem:[%s4316_s7 + $0x10] sm:$0xff]  ;;  %v2091_v12 = vld [vmem:[%s4316_s7 + $0x8] sm:$0xff]  ;;  %v2079_v21 = vsub.s32 0, %v2078_v6 }
 0x5f9   : > { %2692 = vmatprep.subr.mxu0 %v3108_v51  ;;  %v2090_v55 = vld [vmem:[%s4316_s7] sm:$0xff] }
 0x5fa   : > { %v4213_v47 = vld [vmem:[#allocation3] sm:$0xf]  ;;  %2693 = vmatpush3.msra.mxu0 %v2103_v56 }
 0x5fb   : > { %v2052_v59 = vsel %vm2051_vm5, %v4213_v47, 0.0  ;;  %v2060_v63 = vmul.f32 %v4213_v47, %v4213_v47  ;;  %2694 = vmatprep.subr.mxu0 %v3108_v51  ;;  %v2075_v17 = vld [vmem:[%s4314_s5] sm:$0x1] }
 0x5fc   : > { %v2053_v3 = vrot.slane %v2052_v59, 4  ;;  %2695 = vmatpush3.msra.mxu0 %v2102_v15  ;;  %v2317_v37 = vld [vmem:[%s4315_s6] ss:$0 sm:$0xff] }
 0x5fd   : > { %v2061_v52 = vsel %vm2051_vm5, %v2060_v63, 0.0  ;;  %2696 = vmatprep.subr.mxu0 %v3108_v51 }
 0x5fe   : > { %v2054_v57 = vadd.f32 %v2053_v3, %v2052_v59  ;;  %v2062_v19 = vrot.slane %v2061_v52, 4  ;;  %2697 = vmatpush3.msra.mxu0 %v2101_v43  ;;  %v2199_v3 = vld [vmem:[%s4317_s8] sm:$0x1] }
 0x5ff   : > { %2698 = vmatprep.subr.mxu0 %v3108_v51 }
 0x600   : > { %v2055_v18 = vrot.slane %v2054_v57, 2  ;;  %v2063_v44 = vadd.f32 %v2062_v19, %v2061_v52  ;;  %2699 = vmatpush3.msra.mxu0 %v2100_v23 }
 0x601   : > { %2700 = vmatprep.subr.mxu0 %v3108_v51 }
 0x602   : > { %v2056_v61 = vadd.f32 %v2055_v18, %v2054_v57  ;;  %v2064_v41 = vrot.slane %v2063_v44, 2  ;;  %2701 = vmatpush3.msra.mxu0 %v2099_v0  ;;  %v2318_v0 = vld [vmem:[%s4318_s9] ss:$0 sm:$0xff] }
 0x603   : > { %2702 = vmatprep.subr.mxu0 %v3108_v51 }
 0x604   : > { %v2057_v24 = vrot.slane %v2056_v61, 1  ;;  %v2065_v48 = vadd.f32 %v2064_v41, %v2063_v44  ;;  %2703 = vmatpush3.msra.mxu0 %v2098_v36 }
 0x605   : > { %2704 = vmatprep.subr.mxu0 %v3108_v51 }
 0x606   : > { %v2058_v13 = vadd.f32 %v2057_v24, %v2056_v61  ;;  %v2066_v27 = vrot.slane %v2065_v48, 1  ;;  %2705 = vmatpush3.msra.mxu0 %v2097_v49 }
 0x607   : > { %2706 = vmatprep.subr.mxu0 %v3108_v51 }
 0x608   : > { %v2059_v7 = vmul.f32 0.25, %v2058_v13  ;;  %v2067_v62 = vadd.f32 %v2066_v27, %v2065_v48  ;;  %2707 = vmatpush3.msra.mxu0 %v2096_v8 }
 0x609   : > { %2708 = vmatprep.subr.mxu0 %v3108_v51 }
 0x60a   : > { %v2068_v1 = vmul.f32 0.25, %v2067_v62  ;;  %v2069_v45 = vmul.f32 %v2059_v7, %v2059_v7  ;;  %2709 = vmatpush3.msra.mxu0 %v2095_v14  ;;  %v2072_v28 = vsub.f32 %v4213_v47, %v2059_v7 }
 0x60b   : > { %2710 = vmatprep.subr.mxu0 %v3108_v51 }
 0x60c   : > { %v2070_v30 = vsub.f32 %v2068_v1, %v2069_v45  ;;  %2711 = vmatpush3.msra.mxu0 %v2094_v16 }
 0x60d   : > { %2712 = vmatprep.subr.mxu0 %v3108_v51 }
 0x60e   : > { %v2071_v34 = vmax.f32 %v2070_v30, 0.0  ;;  %2713 = vmatpush3.msra.mxu0 %v2093_v46 }
 0x60f   : > { %2714 = vmatprep.subr.mxu0 %v3108_v51 }
 0x610   : > { %v2073_v54 = vadd.f32 1e-05, %v2071_v34  ;;  %2715 = vmatpush3.msra.mxu0 %v2092_v11 }
 0x611   : > { %2716 = vmatprep.subr.mxu0 %v3108_v51 }
 0x612   : > { %2968 = vrsqrt.f32 %v2073_v54  ;;  %2717 = vmatpush3.msra.mxu0 %v2091_v12 }
 0x613   : > { %2718 = vmatprep.subr.mxu0 %v3108_v51 }
 0x614   : > { %2719 = vmatpush3.msra.mxu0 %v2090_v55 }
 0x61f   : > { %v2969_v10 = vpop.eup %2968 }
 0x620   : > { %v2076_v25 = vmul.f32 %v2969_v10, %v2075_v17 }
 0x622   : > { %v2080_v42 = vrot.slane %v2076_v25, %v2079_v21 }
 0x624   : > { %v2081_v39 = vmul.f32 %v2080_v42, %v2072_v28 }
 0x626   : > { %v2089_v40 = vadd.f32 %v2317_v37, %v2081_v39 }
 0x628   : > { %2721 = vmatmul.mubr.f32.vlgmr.msra.gmra.mxu0 %v2089_v40 }
 0x6e8   : > { %v2172_v53 = vpop.f32.mrf.mxu0 }
 0x6e9   : > { %v2176_v38 = vsel %vm2051_vm5, %v2172_v53, 0.0  ;;  %v2184_v4 = vmul.f32 %v2172_v53, %v2172_v53 }
 0x6ea   : > { %v2177_v22 = vrot.slane %v2176_v38, 4  ;;  %v2722_v26 = vpop.f32.mrf.mxu0 }
 0x6eb   : > { %v2185_v33 = vsel %vm2051_vm5, %v2184_v4, 0.0 }
 0x6ec   : > { %v2178_v31 = vadd.f32 %v2177_v22, %v2176_v38  ;;  %v2186_v20 = vrot.slane %v2185_v33, 4 }
 0x6ee   : > { %v2179_v35 = vrot.slane %v2178_v31, 2  ;;  %v2187_v5 = vadd.f32 %v2186_v20, %v2185_v33 }
 0x6f0   : > { %v2180_v60 = vadd.f32 %v2179_v35, %v2178_v31  ;;  %v2188_v58 = vrot.slane %v2187_v5, 2 }
 0x6f2   : > { %v2181_v32 = vrot.slane %v2180_v60, 1  ;;  %v2189_v2 = vadd.f32 %v2188_v58, %v2187_v5 }
 0x6f4   : > { %v2182_v50 = vadd.f32 %v2181_v32, %v2180_v60  ;;  %v2190_v51 = vrot.slane %v2189_v2, 1 }
 0x6f6   : > { %v2183_v29 = vmul.f32 0.25, %v2182_v50  ;;  %v2191_v56 = vadd.f32 %v2190_v51, %v2189_v2 }
 0x6f8   : > { %v2192_v15 = vmul.f32 0.25, %v2191_v56  ;;  %v2193_v47 = vmul.f32 %v2183_v29, %v2183_v29  ;;  %v2196_v57 = vsub.f32 %v2172_v53, %v2183_v29 }
 0x6fa   : > { %v2194_v59 = vsub.f32 %v2192_v15, %v2193_v47 }
 0x6fc   : > { %v2195_v63 = vmax.f32 %v2194_v59, 0.0 }
 0x6fe   : > { %v2197_v43 = vadd.f32 1e-05, %v2195_v63 }
 0x700   : > { %2970 = vrsqrt.f32 %v2197_v43 }
 0x70d   : > { %v2971_v52 = vpop.eup %2970 }
 0x70e   : > { %v2200_v23 = vmul.f32 %v2971_v52, %v2199_v3 }
 0x710   : > { %v2204_v19 = vrot.slane %v2200_v23, %v2079_v21 }
 0x712   : > { %v2205_v18 = vmul.f32 %v2204_v19, %v2196_v57 }
 0x714   : > { %v2213_v44 = vadd.f32 %v2318_v0, %v2205_v18 }
 0x716   : > { %v2319_v36 = vmul.f32 -1.442695, %v2213_v44 }
 0x718   : > { %2972 = vpow2.f32 %v2319_v36 }
 0x725   : > { %v2973_v61 = vpop.eup %2972 }
 0x726   : > { %v2217_v41 = vadd.f32 1.0, %v2973_v61 }
 0x728   : > { %2974 = vrcp.f32 %v2217_v41 }
 0x735   : > { %v2975_v49 = vpop.eup %2974 }
 0x736   : > { %v2220_v24 = vmul.f32 %v2975_v49, %v2089_v40 }
 0x738   : > { %2221 = vst [vmem:[#allocation9] sm:$0xf] %v2220_v24 }
 0x739 PF: > { %p2744_p8 = scmp.eq.s32.totalorder %s3185_s17, 3  ;;  %s3110_s19 = smov [#allocation9]  }
 0x73a   : > { %s2229_s28 = sshll.u32 %s3110_s19, 4  ;;  %s2230_s28 = int_to_ptr.vmem [resolvable:$true] %s2229_s28 }
 0x73b   : > { %s3030_s22 = scalar_lea.vmem %s2230_s28, 64  ;;  %p3037_p11 = scmp.lt.s32.totalorder %s2230_s28, %s2230_s28 }
 0x73c   : > { %p3031_p7 = scmp.ne.s32.totalorder %s2230_s28, %s3030_s22  ;;  %p3038_p12 = scmp.lt.s32.totalorder %s3030_s22, %s3030_s22 }
 0x73e   : > { %p3032_p9 = pnand %p3031_p7, %p2744_p8  ;;  %p3039_p13 = por %p3038_p12, %p3037_p11 }
 0x740   : > { %p3033_p10 = pneg %p3032_p9 }
 0x742   : > { %p3040_p2 = pnand %p3039_p13, %p3033_p10 }
 0x744   : > { %3043 = shalt.err (!%p3040_p2)
}
 0x745   : > { %2730 = dma.vmem_to_hbm [thread:$0]  (%p2744_p8), %s2230_s28, 64, %s4319_s10, [#allocation6]  }
 0x746   : > { %3079 = dma.done.wait (%p2744_p8), [#allocation6], 64  }
 0x747   : > { %3081 = vsyncadd (%p2744_p8), [#allocation6], 4294967232 }
 0x748 PF: > { %s4337_s16 = sld [smem:[#allocation13_spill]]  ;;  %s4338_s13 = smov %s3088_s14 }
 0x749   : > { %s4339_s14 = smov %s3092_s15  ;;  %s4340_s15 = smov %s3231_s11 }
 0x74e   : > { %p22_p4 = scmp.ge.s32.totalorder %s4337_s16, 6  }
 0x750   :  { %24 = sbr.rel (!%p22_p4) target bundleno = 5 (0x5), region = 111 }
 0x755   :  { %2242 = vsyncpa [#allocation5], 1 }
 0x756   :  { %2244 = vsyncpa [#allocation5 + $0x1], 1 }
 0x757   :  { %2245 = vsyncpa [#allocation8], 1 }
 0x758   :  { %2247 = vsyncpa [#allocation8 + $0x1], 1 }
 0x759   :  { %2248 = vsyncpa [#allocation6], 1 }
 0x75a   :  { %2250 = vsyncpa [#allocation6 + $0x1], 1 }

</bundles_post_ra>
